<compile_context>
chip_gen: v6e
topology: v6e:2x2x1
jax: 0.10.0
libtpu: 0.0.40
codegen_flags: <defaults>
</compile_context>

<pallas_src>
import jax
import jax.numpy as jnp
from jax.experimental import pallas as pl
from jax.experimental.pallas import tpu as pltpu

# Hyperparameters from DropNN.py
FIRST = 32
SECOND = 16
THIRD = 16
DROP1 = 0.2   # identity at inference
DROP2 = 0.5   # identity at inference
LEAKY_SLOPE = 0.2
_LANES = 128


def _round_up(n, m):
    return ((n + m - 1) // m) * m


def _leaky_relu(x, slope=LEAKY_SLOPE):
    # Valid for 0 < slope < 1: max(x, slope*x) == leaky_relu(x). 2 VPU ops, no select.
    return jnp.maximum(x, slope * x)


# ---------------------------------------------------------------------------
# Kernel
# ---------------------------------------------------------------------------
def trinet_kernel(xp_ref,
                  w1_ref, b1_ref, w2_ref, b2_ref,
                  w3_ref, b3_ref, w4_ref, b4_ref,
                  o_ref):
    """Packed layout: each row holds G batch elements side by side on the lanes.

    xp_ref : [tbr, G*Din]     (G*Din == 128 lanes when Din divides 128)
    wK_ref : [G*inK, G*outK]  block-diagonal expansion of the PyTorch weight W^T
    bK_ref : [1,   G*outK]    bias tiled over the G groups (f32)
    o_ref  : [tbr, G]         sigmoid outputs; row-major flatten == natural batch order
    """
    cdt = w1_ref.dtype                       # MXU compute dtype (bf16); acc is f32.

    x = xp_ref[...].astype(cdt)

    # Layer 1: Linear(in, FIRST) + LeakyReLU(0.2)
    h = jnp.dot(x, w1_ref[...], preferred_element_type=jnp.float32) + b1_ref[...]
    h = _leaky_relu(h)
    # Dropout(DROP1): identity in eval mode.

    # Layer 2: Linear(FIRST, SECOND) + LeakyReLU(0.2)
    h = jnp.dot(h.astype(cdt), w2_ref[...], preferred_element_type=jnp.float32) + b2_ref[...]
    h = _leaky_relu(h)
    # Dropout(DROP2): identity in eval mode.

    # Layer 3: Linear(SECOND, THIRD) + LeakyReLU(0.2)
    h = jnp.dot(h.astype(cdt), w3_ref[...], preferred_element_type=jnp.float32) + b3_ref[...]
    h = _leaky_relu(h)

    # Layer 4: Linear(THIRD, 1) + Sigmoid
    z = jnp.dot(h.astype(cdt), w4_ref[...], preferred_element_type=jnp.float32) + b4_ref[...]

    # Numerically stable sigmoid: exp(-|z|) <= 1; reciprocal rides the EUP slot.
    e = jnp.exp(-jnp.abs(z))
    inv = pl.reciprocal(1.0 + e, approx=True)
    o_ref[...] = (jnp.where(z >= 0, 1.0, e) * inv).astype(o_ref.dtype)


# ---------------------------------------------------------------------------
# Wrapper helpers
# ---------------------------------------------------------------------------
def _expand_weight(w, g, dtype):
    """PyTorch weight [out, in] -> block-diagonal packed weight [g*in, g*out].

    We[g0*in + i, g1*out + o] = w[o, i] if g0 == g1 else 0.
    """
    out_f, in_f = w.shape
    eye = jnp.eye(g, dtype=w.dtype)
    we = jnp.einsum("gh,oi->giho", eye, w)           # [g, in, g, out]
    return we.reshape(g * in_f, g * out_f).astype(dtype)


def _expand_bias(b, g):
    """Bias [out] -> [1, g*out] tiled over the g groups (kept in f32)."""
    b = b.reshape(-1).astype(jnp.float32)
    return jnp.tile(b, (g,)).reshape(1, g * b.shape[0])


def _tile_rows(bp, tile_b, g):
    """Packed rows per grid step (sublane-aligned, >=2 grid steps when possible)."""
    req = max(1, int(tile_b) // g)
    req = max(8, (req // 8) * 8)
    if bp > 8:
        # Keep at least 2 grid steps so v7x's two TensorCores both get work
        # under dimension_semantics=("parallel",). Harmless on v5e/v6e.
        req = min(req, _round_up((bp + 1) // 2, 8))
    return bp if req >= bp else req


def _vmem_limit_bytes(tbr, g, din, x_itemsize, cdt_itemsize):
    """Rough VMEM need; only override the scoped limit when the tile requires it."""
    wpack = g * din
    x_bytes = 2 * tbr * _round_up(wpack, _LANES) * x_itemsize        # 2x-buffered x tiles
    o_bytes = 2 * tbr * _round_up(g, _LANES) * 4                     # 2x-buffered out tiles
    w_elems = (wpack * g * FIRST + g * FIRST * g * SECOND
               + g * SECOND * g * THIRD + g * THIRD * g)
    w_bytes = w_elems * cdt_itemsize + g * (FIRST + SECOND + THIRD + 1) * 4
    act_bytes = tbr * g * (FIRST + SECOND + THIRD + 1) * (4 + cdt_itemsize)
    est = x_bytes + o_bytes + w_bytes + act_bytes
    if est <= 12 * 2**20:
        return None   # fits every generation's default scoped VMEM limit
    try:
        # Cap against the physical VMEM of this generation (v7x: 64 MiB / TC).
        cap = int(pltpu.get_tpu_info().vmem_capacity_bytes * 0.7)
    except Exception:
        cap = 56 * 2**20
    return int(min(cap, _round_up(int(est * 1.7), 2**20)))


# ---------------------------------------------------------------------------
# Forward
# ---------------------------------------------------------------------------
def trinet_forward(x, params, tile_b=32768, compute_dtype=jnp.bfloat16):
    """x: [B, in_channels] -> [B, 1] float32 (inference / eval mode).

    Weights in `params` use PyTorch layout: W [out, in], b [out].
    tile_b: batch rows processed per grid step (amortises per-step overhead).
    """
    (w1, b1, w2, b2, w3, b3, w4, b4) = params
    B, din = x.shape

    # Pack G batch rows per 128-lane row: a free, contiguous reshape of row-major x.
    g = max(1, _LANES // din) if din <= _LANES else 1
    b_pad = _round_up(B, g)
    if b_pad != B:
        # Fallback only (ragged batch): tiny zero pad so the packed reshape is exact.
        x = jnp.pad(x, ((0, b_pad - B), (0, 0)))
    bp = b_pad // g
    xp = x.reshape(bp, g * din)

    # Block-diagonal packed weights (tiny, resident in VMEM) and group-tiled biases.
    w1e = _expand_weight(w1, g, compute_dtype); b1p = _expand_bias(b1, g)
    w2e = _expand_weight(w2, g, compute_dtype); b2p = _expand_bias(b2, g)
    w3e = _expand_weight(w3, g, compute_dtype); b3p = _expand_bias(b3, g)
    w4e = _expand_weight(w4, g, compute_dtype); b4p = _expand_bias(b4, g)

    tbr = _tile_rows(bp, tile_b, g)
    # cdiv grid: the partial last block's OOB loads are never observed (their
    # rows only affect masked/clipped output stores past the array bound).
    grid = (pl.cdiv(bp, tbr),)

    resident = lambda a: pl.BlockSpec(a.shape, lambda i: (0, 0))

    out = pl.pallas_call(
        trinet_kernel,
        out_shape=jax.ShapeDtypeStruct((bp, g), jnp.float32),
        grid=grid,
        in_specs=[
            pl.BlockSpec((tbr, g * din), lambda i: (i, 0)),   # x tile (pipelined)
            resident(w1e), resident(b1p),
            resident(w2e), resident(b2p),
            resident(w3e), resident(b3p),
            resident(w4e), resident(b4p),
        ],
        out_specs=pl.BlockSpec((tbr, g), lambda i: (i, 0)),
        compiler_params=pltpu.CompilerParams(
            dimension_semantics=("parallel",),
            vmem_limit_bytes=_vmem_limit_bytes(
                tbr, g, din, x.dtype.itemsize, jnp.dtype(compute_dtype).itemsize),
        ),
    )(xp, w1e, b1p, w2e, b2p, w3e, b3p, w4e, b4p)

    out = out.reshape(b_pad, 1)        # row-major flatten == natural batch order (free)
    return out if b_pad == B else out[:B]


# ---------------------------------------------------------------------------
# Synthetic params + pure-JAX reference
# ---------------------------------------------------------------------------
def init_params(key, in_channels):
    """Deterministic synthetic parameters (shapes follow TriNet.__init__)."""
    ks = jax.random.split(key, 8)

    def lin(kw, kb, fan_in, fan_out):
        bound = 1.0 / (fan_in ** 0.5)
        w = jax.random.uniform(kw, (fan_out, fan_in), jnp.float32, -bound, bound)
        b = jax.random.uniform(kb, (fan_out,), jnp.float32, -bound, bound)
        return w, b

    w1, b1 = lin(ks[0], ks[1], in_channels, FIRST)
    w2, b2 = lin(ks[2], ks[3], FIRST, SECOND)
    w3, b3 = lin(ks[4], ks[5], SECOND, THIRD)
    w4, b4 = lin(ks[6], ks[7], THIRD, 1)
    return (w1, b1, w2, b2, w3, b3, w4, b4)


def trinet_reference(x, params):
    """Pure-JAX f32 reference (x: [B, Din]) for sanity checking."""
    (w1, b1, w2, b2, w3, b3, w4, b4) = params
    leaky = lambda t: jnp.where(t > 0, t, LEAKY_SLOPE * t)
    h = leaky(x @ w1.T + b1)
    h = leaky(h @ w2.T + b2)
    h = leaky(h @ w3.T + b3)
    return jax.nn.sigmoid(h @ w4.T + b4)


if __name__ == "__main__":
    key = jax.random.PRNGKey(0)
    k_p, k_x1, k_x2 = jax.random.split(key, 3)

    in_channels = 8
    params = init_params(k_p, in_channels)

    # Test 1: batch is a multiple of the packing group (G=16) but not of the tile,
    # so the 1-D grid has 2 pipelined steps and the last block is partial
    # (exercises cdiv-grid store masking).
    batch1 = 4000
    x1 = jax.random.normal(k_x1, (batch1, in_channels), jnp.float32)
    out1 = jax.block_until_ready(trinet_forward(x1, params, tile_b=2048))
    ref1 = trinet_reference(x1, params)
    assert out1.shape == (batch1, 1), out1.shape
    # bf16 MXU inputs + approx reciprocal -> loosened tolerance vs the f32 reference.
    assert jnp.max(jnp.abs(out1 - ref1)) < 2e-2, float(jnp.max(jnp.abs(out1 - ref1)))

    # Test 2: ragged batch (not a multiple of G) -> zero-pad fallback path, default tile.
    batch2 = 300
    x2 = jax.random.normal(k_x2, (batch2, in_channels), jnp.float32)
    out2 = jax.block_until_ready(trinet_forward(x2, params))
    ref2 = trinet_reference(x2, params)
    assert out2.shape == (batch2, 1), out2.shape
    assert jnp.max(jnp.abs(out2 - ref2)) < 2e-2, float(jnp.max(jnp.abs(out2 - ref2)))

    print("KERNEL_OK")
</pallas_src>

<mosaic_0001>
module attributes {stable_mosaic.version = 11 : i64} {
  func.func @trinet_kernel(%arg0: i32, %arg1: memref<128x128xf32, #tpu.memory_space<vmem>>, %arg2: memref<128x512xbf16, #tpu.memory_space<vmem>>, %arg3: memref<1x512xf32, #tpu.memory_space<vmem>>, %arg4: memref<512x256xbf16, #tpu.memory_space<vmem>>, %arg5: memref<1x256xf32, #tpu.memory_space<vmem>>, %arg6: memref<256x256xbf16, #tpu.memory_space<vmem>>, %arg7: memref<1x256xf32, #tpu.memory_space<vmem>>, %arg8: memref<256x16xbf16, #tpu.memory_space<vmem>>, %arg9: memref<1x16xf32, #tpu.memory_space<vmem>>, %arg10: memref<128x16xf32, #tpu.memory_space<vmem>>) attributes {dimension_semantics = [#tpu.dimension_semantics<parallel>], iteration_bounds = array<i64: 2>, scalar_prefetch = 0 : i64, scratch_operands = 0 : i64, tpu.core_type = #tpu.core_type<tc>, window_params = [{transform_indices = @transform_0, window_bounds = array<i64: 128, 128>}, {pipeline_mode = #tpu.pipeline_mode<synchronous>, transform_indices = @transform_1, window_bounds = array<i64: 128, 512>}, {pipeline_mode = #tpu.pipeline_mode<synchronous>, transform_indices = @transform_2, window_bounds = array<i64: 1, 512>}, {pipeline_mode = #tpu.pipeline_mode<synchronous>, transform_indices = @transform_3, window_bounds = array<i64: 512, 256>}, {pipeline_mode = #tpu.pipeline_mode<synchronous>, transform_indices = @transform_4, window_bounds = array<i64: 1, 256>}, {pipeline_mode = #tpu.pipeline_mode<synchronous>, transform_indices = @transform_5, window_bounds = array<i64: 256, 256>}, {pipeline_mode = #tpu.pipeline_mode<synchronous>, transform_indices = @transform_6, window_bounds = array<i64: 1, 256>}, {pipeline_mode = #tpu.pipeline_mode<synchronous>, transform_indices = @transform_7, window_bounds = array<i64: 256, 16>}, {pipeline_mode = #tpu.pipeline_mode<synchronous>, transform_indices = @transform_8, window_bounds = array<i64: 1, 16>}, {transform_indices = @transform_9, window_bounds = array<i64: 128, 16>}]} {
    %c0 = arith.constant 0 : index
    %c0_0 = arith.constant 0 : index
    %0 = vector.load %arg1[%c0, %c0_0] : memref<128x128xf32, #tpu.memory_space<vmem>>, vector<128x128xf32>
    %1 = arith.truncf %0 : vector<128x128xf32> to vector<128x128xbf16>
    %c0_1 = arith.constant 0 : index
    %c0_2 = arith.constant 0 : index
    %2 = vector.load %arg2[%c0_1, %c0_2] : memref<128x512xbf16, #tpu.memory_space<vmem>>, vector<128x512xbf16>
    %cst = arith.constant dense<0.000000e+00> : vector<128x512xf32>
    %3 = tpu.matmul %1, %2, %cst {dimension_numbers = #tpu.dot_dimension_numbers<[1], [0], [0], [1], [0, 0, 1, 1], [], []>} : vector<128x128xbf16>, vector<128x512xbf16>, vector<128x512xf32> -> vector<128x512xf32>
    %c0_3 = arith.constant 0 : index
    %c0_4 = arith.constant 0 : index
    %4 = vector.load %arg3[%c0_3, %c0_4] : memref<1x512xf32, #tpu.memory_space<vmem>>, vector<1x512xf32>
    %5 = vector.broadcast %4 : vector<1x512xf32> to vector<128x512xf32>
    %6 = arith.addf %3, %5 : vector<128x512xf32>
    %cst_5 = arith.constant 2.000000e-01 : f32
    %7 = vector.broadcast %cst_5 : f32 to vector<128x512xf32>
    %8 = arith.mulf %7, %6 : vector<128x512xf32>
    %9 = arith.maximumf %6, %8 : vector<128x512xf32>
    %10 = arith.truncf %9 : vector<128x512xf32> to vector<128x512xbf16>
    %c0_6 = arith.constant 0 : index
    %c0_7 = arith.constant 0 : index
    %11 = vector.load %arg4[%c0_6, %c0_7] : memref<512x256xbf16, #tpu.memory_space<vmem>>, vector<512x256xbf16>
    %cst_8 = arith.constant dense<0.000000e+00> : vector<128x256xf32>
    %12 = tpu.matmul %10, %11, %cst_8 {dimension_numbers = #tpu.dot_dimension_numbers<[1], [0], [0], [1], [0, 0, 1, 1], [], []>} : vector<128x512xbf16>, vector<512x256xbf16>, vector<128x256xf32> -> vector<128x256xf32>
    %c0_9 = arith.constant 0 : index
    %c0_10 = arith.constant 0 : index
    %13 = vector.load %arg5[%c0_9, %c0_10] : memref<1x256xf32, #tpu.memory_space<vmem>>, vector<1x256xf32>
    %14 = vector.broadcast %13 : vector<1x256xf32> to vector<128x256xf32>
    %15 = arith.addf %12, %14 : vector<128x256xf32>
    %cst_11 = arith.constant 2.000000e-01 : f32
    %16 = vector.broadcast %cst_11 : f32 to vector<128x256xf32>
    %17 = arith.mulf %16, %15 : vector<128x256xf32>
    %18 = arith.maximumf %15, %17 : vector<128x256xf32>
    %19 = arith.truncf %18 : vector<128x256xf32> to vector<128x256xbf16>
    %c0_12 = arith.constant 0 : index
    %c0_13 = arith.constant 0 : index
    %20 = vector.load %arg6[%c0_12, %c0_13] : memref<256x256xbf16, #tpu.memory_space<vmem>>, vector<256x256xbf16>
    %cst_14 = arith.constant dense<0.000000e+00> : vector<128x256xf32>
    %21 = tpu.matmul %19, %20, %cst_14 {dimension_numbers = #tpu.dot_dimension_numbers<[1], [0], [0], [1], [0, 0, 1, 1], [], []>} : vector<128x256xbf16>, vector<256x256xbf16>, vector<128x256xf32> -> vector<128x256xf32>
    %c0_15 = arith.constant 0 : index
    %c0_16 = arith.constant 0 : index
    %22 = vector.load %arg7[%c0_15, %c0_16] : memref<1x256xf32, #tpu.memory_space<vmem>>, vector<1x256xf32>
    %23 = vector.broadcast %22 : vector<1x256xf32> to vector<128x256xf32>
    %24 = arith.addf %21, %23 : vector<128x256xf32>
    %cst_17 = arith.constant 2.000000e-01 : f32
    %25 = vector.broadcast %cst_17 : f32 to vector<128x256xf32>
    %26 = arith.mulf %25, %24 : vector<128x256xf32>
    %27 = arith.maximumf %24, %26 : vector<128x256xf32>
    %28 = arith.truncf %27 : vector<128x256xf32> to vector<128x256xbf16>
    %c0_18 = arith.constant 0 : index
    %c0_19 = arith.constant 0 : index
    %29 = vector.load %arg8[%c0_18, %c0_19] : memref<256x16xbf16, #tpu.memory_space<vmem>>, vector<256x16xbf16>
    %cst_20 = arith.constant dense<0.000000e+00> : vector<128x16xf32>
    %30 = tpu.matmul %28, %29, %cst_20 {dimension_numbers = #tpu.dot_dimension_numbers<[1], [0], [0], [1], [0, 0, 1, 1], [], []>} : vector<128x256xbf16>, vector<256x16xbf16>, vector<128x16xf32> -> vector<128x16xf32>
    %c0_21 = arith.constant 0 : index
    %c0_22 = arith.constant 0 : index
    %31 = vector.load %arg9[%c0_21, %c0_22] : memref<1x16xf32, #tpu.memory_space<vmem>>, vector<1x16xf32>
    %32 = vector.broadcast %31 : vector<1x16xf32> to vector<128x16xf32>
    %33 = arith.addf %30, %32 : vector<128x16xf32>
    %34 = math.absf %33 : vector<128x16xf32>
    %cst_23 = arith.constant 0.000000e+00 : f32
    %35 = vector.broadcast %cst_23 : f32 to vector<128x16xf32>
    %36 = arith.subf %35, %34 : vector<128x16xf32>
    %37 = math.exp %36 : vector<128x16xf32>
    %cst_24 = arith.constant 1.000000e+00 : f32
    %38 = vector.broadcast %cst_24 : f32 to vector<128x16xf32>
    %39 = arith.addf %38, %37 : vector<128x16xf32>
    %40 = tpu.reciprocal %39 {approx = true} : vector<128x16xf32> -> vector<128x16xf32>
    %cst_25 = arith.constant 0.000000e+00 : f32
    %41 = vector.broadcast %cst_25 : f32 to vector<128x16xf32>
    %42 = arith.cmpf oge, %33, %41 : vector<128x16xf32>
    %cst_26 = arith.constant 1.000000e+00 : f32
    %43 = vector.broadcast %cst_26 : f32 to vector<128x16xf32>
    %44 = arith.select %42, %43, %37 : vector<128x16xi1>, vector<128x16xf32>
    %45 = arith.mulf %44, %40 : vector<128x16xf32>
    %c0_27 = arith.constant 0 : index
    %c0_28 = arith.constant 0 : index
    %46 = vector.load %arg10[%c0_27, %c0_28] : memref<128x16xf32, #tpu.memory_space<vmem>>, vector<128x16xf32>
    tpu.vector_store %arg10[%c0_27, %c0_28], %45 {strides = array<i32>} : memref<128x16xf32, #tpu.memory_space<vmem>>, vector<128x16xf32>,
    return
  }
  func.func @transform_0(%arg0: i32) -> (i32, i32) {
    %c0_i32 = arith.constant 0 : i32
    %c0_i32_0 = arith.constant 0 : i32
    return %arg0, %c0_i32 : i32, i32
  }
  func.func @transform_1(%arg0: i32) -> (i32, i32) {
    %c0_i32 = arith.constant 0 : i32
    %c0_i32_0 = arith.constant 0 : i32
    %c0_i32_1 = arith.constant 0 : i32
    return %c0_i32, %c0_i32_0 : i32, i32
  }
  func.func @transform_2(%arg0: i32) -> (i32, i32) {
    %c0_i32 = arith.constant 0 : i32
    %c0_i32_0 = arith.constant 0 : i32
    %c0_i32_1 = arith.constant 0 : i32
    return %c0_i32, %c0_i32_0 : i32, i32
  }
  func.func @transform_3(%arg0: i32) -> (i32, i32) {
    %c0_i32 = arith.constant 0 : i32
    %c0_i32_0 = arith.constant 0 : i32
    %c0_i32_1 = arith.constant 0 : i32
    return %c0_i32, %c0_i32_0 : i32, i32
  }
  func.func @transform_4(%arg0: i32) -> (i32, i32) {
    %c0_i32 = arith.constant 0 : i32
    %c0_i32_0 = arith.constant 0 : i32
    %c0_i32_1 = arith.constant 0 : i32
    return %c0_i32, %c0_i32_0 : i32, i32
  }
  func.func @transform_5(%arg0: i32) -> (i32, i32) {
    %c0_i32 = arith.constant 0 : i32
    %c0_i32_0 = arith.constant 0 : i32
    %c0_i32_1 = arith.constant 0 : i32
    return %c0_i32, %c0_i32_0 : i32, i32
  }
  func.func @transform_6(%arg0: i32) -> (i32, i32) {
    %c0_i32 = arith.constant 0 : i32
    %c0_i32_0 = arith.constant 0 : i32
    %c0_i32_1 = arith.constant 0 : i32
    return %c0_i32, %c0_i32_0 : i32, i32
  }
  func.func @transform_7(%arg0: i32) -> (i32, i32) {
    %c0_i32 = arith.constant 0 : i32
    %c0_i32_0 = arith.constant 0 : i32
    %c0_i32_1 = arith.constant 0 : i32
    return %c0_i32, %c0_i32_0 : i32, i32
  }
  func.func @transform_8(%arg0: i32) -> (i32, i32) {
    %c0_i32 = arith.constant 0 : i32
    %c0_i32_0 = arith.constant 0 : i32
    %c0_i32_1 = arith.constant 0 : i32
    return %c0_i32, %c0_i32_0 : i32, i32
  }
  func.func @transform_9(%arg0: i32) -> (i32, i32) {
    %c0_i32 = arith.constant 0 : i32
    %c0_i32_0 = arith.constant 0 : i32
    return %arg0, %c0_i32 : i32, i32
  }
}

</mosaic_0001>

<bundles_post_ra>
// kernel: tpu_custom_call.1
= control target key start
LH: loop header
LB: loop body
LE: loop exit
PB: predicated region body
PF: predicated region fallthrough
CT: control target
= control target key end

     0   :  { %14 = vsyncpa [#allocation3], 0  ;;  %s4033_s0 = inlined_call_operand.hbm [shape: f32[250,128], index: 0, kind: input, shape index: {}]   ;;  %s4034_s1 = inlined_call_operand.hbm [shape: bf16[128,512], index: 1, kind: input, shape index: {}]   ;;  %s4035_s2 = inlined_call_operand.vmem [shape: f32[1,512], index: 2, kind: input, shape index: {}]   ;;  %s4036_s3 = inlined_call_operand.hbm [shape: bf16[512,256], index: 3, kind: input, shape index: {}]   ;;  %s4037_s4 = inlined_call_operand.vmem [shape: f32[1,256], index: 4, kind: input, shape index: {}]   ;;  %s4038_s5 = inlined_call_operand.hbm [shape: bf16[256,256], index: 5, kind: input, shape index: {}]   ;;  %s4039_s6 = inlined_call_operand.vmem [shape: f32[1,256], index: 6, kind: input, shape index: {}]   ;;  %s4040_s7 = inlined_call_operand.vmem [shape: bf16[256,16], index: 7, kind: input, shape index: {}]   ;;  %s4041_s8 = inlined_call_operand.vmem [shape: f32[1,16], index: 8, kind: input, shape index: {}]   ;;  %s4042_s9 = inlined_call_operand.vmem [shape: f32[250,16], index: 9, kind: output, shape index: {}]  }
   0x1   :  { %16 = vsyncpa [#allocation3 + $0x1], 0 }
   0x2   :  { %17 = vsyncpa [#allocation5], 0 }
   0x3   :  { %18 = vsyncpa [#allocation8], 0  ;;  %s3397_s30 = smov 0   ;;  %s3399_s10 = smov 0  }
   0x4   :  { %s3401_s11 = smov 0   ;;  %s3403_s12 = smov 0  }
   0x5 LB: > { %s4045_s13 = sadd.s32 4294967295, %s3336_s12   ;;  %p44_p0 = scmp.ne.s32.totalorder %s3328_s10, %s3324_s30  ;;  %s3336_s12 = sphi %s3403_s12, %s4064_s12   ;;  %s3332_s11 = sphi %s3401_s11, %s4063_s11   ;;  %s3328_s10 = sphi %s3399_s10, %s4062_s10   ;;  %s3324_s30 = sphi %s3397_s30, %s4061_s30  }
   0x6   : > { %p3419_p1 = scmp.eq.s32.totalorder %s4045_s13, 0  ;;  %p2614_p2 = scmp.ge.s32.totalorder %s3336_s12, 1 }
   0x7   : > { %p249_p3 = scmp.lt.s32.totalorder %s3336_s12, 3  ;;  %s3338_s17 = smov [#allocation4]  }
   0x8   : > { %s4050_s14 = scalar_select %p3419_p1, 1, 0 }
   0x9   : > { %p3427_p4 = por %p3419_p1, %p44_p0  ;;  %p3431_p5 = pnand %p2614_p2, %p249_p3 }
   0xa   : > { %s261_s18 = sshll.u32 %s3338_s17, 4  ;;  %s3339_s20 = smov [#allocation6]   ;;  %s262_s18 = int_to_ptr.vmem [resolvable:$true] %s261_s18 }
   0xb   : > { %s4051_s15 = scalar_select %p3427_p4, 1, 0 }
   0xc   : > { %s4052_s16 = scalar_select %p3431_p5, 1, 0 }
   0xd   : > { %p2855_p6 = pneg %p3431_p5  ;;  %s277_s21 = sshll.u32 %s3339_s20, 4  ;;  %s278_s21 = int_to_ptr.vmem [resolvable:$true] %s277_s21 }
   0xe   : > { %s3199_s22 = scalar_lea.vmem %s262_s18, 4096  ;;  %p3207_p12 = scmp.lt.s32.totalorder %s262_s18, %s262_s18 }
   0xf   : > { %p3439_p7 = pnand %p2855_p6, %p3419_p1  ;;  %p3200_p9 = scmp.ne.s32.totalorder %s262_s18, %s3199_s22 }
  0x10   : > { %p3208_p13 = scmp.lt.s32.totalorder %s3199_s22, %s3199_s22 }
  0x11   : > { %p3190_p8 = pneg %p3439_p7 }
  0x12   : > { %p3209_p0 = por %p3208_p13, %p3207_p12 }
  0x13   : > { %p3202_p10 = pnand %p3200_p9, %p3190_p8 }
  0x15   : > { %p3203_p11 = pneg %p3202_p10 }
  0x17   : > { %p3210_p2 = pnand %p3209_p0, %p3203_p11 }
  0x19   : > { %3213 = shalt.err (!%p3210_p2)
}
  0x1a   : > { %s3340_s23 = smov 256   ;;  %s3341_s24 = smov 16  }
  0x1b   : > { %2858 = dma.hbm_to_vmem [thread:$0]  (!%p3439_p7), %s4034_s1, 4096, %s262_s18, [#allocation5], %s3340_s23, %s3340_s23, %s3341_s24  }
  0x1c   : > { %s3225_s27 = scalar_lea.vmem %s278_s21, 8192  ;;  %p3233_p10 = scmp.lt.s32.totalorder %s278_s21, %s278_s21 }
  0x1d   : > { %p3226_p3 = scmp.ne.s32.totalorder %s278_s21, %s3225_s27  ;;  %p3234_p1 = scmp.lt.s32.totalorder %s3225_s27, %s3225_s27 }
  0x1f   : > { %p3228_p6 = pnand %p3226_p3, %p3190_p8  ;;  %p3235_p12 = por %p3234_p1, %p3233_p10 }
  0x21   : > { %p3229_p9 = pneg %p3228_p6 }
  0x23   : > { %p3236_p11 = pnand %p3235_p12, %p3229_p9 }
  0x25   : > { %3239 = shalt.err (!%p3236_p11)
}
  0x26   : > { %s4046_s28 = smov 128   ;;  %s4047_s29 = smov 8  }
  0x27   : > { %2861 = dma.hbm_to_vmem [thread:$0]  (!%p3439_p7), %s4036_s3, 8192, %s278_s21, [#allocation5], %s4046_s28, %s4046_s28, %s4047_s29  }
  0x28   : > { %s3344_s18 = smov [#allocation7]   ;;  %s3465_s22 = sadd.s32 1, %s3336_s12  }
  0x29   : > { %s293_s20 = sshll.u32 %s3344_s18, 4  ;;  %s294_s20 = int_to_ptr.vmem [resolvable:$true] %s293_s20 }
  0x2a   : > { %s3251_s23 = scalar_lea.vmem %s294_s20, 4096  ;;  %p3259_p2 = scmp.lt.s32.totalorder %s294_s20, %s294_s20 }
  0x2b   : > { %p3252_p1 = scmp.ne.s32.totalorder %s294_s20, %s3251_s23  ;;  %p3260_p3 = scmp.lt.s32.totalorder %s3251_s23, %s3251_s23 }
  0x2d   : > { %p3254_p13 = pnand %p3252_p1, %p3190_p8  ;;  %p3261_p6 = por %p3260_p3, %p3259_p2 }
  0x2f   : > { %p3255_p0 = pneg %p3254_p13 }
  0x31   : > { %p3262_p9 = pnand %p3261_p6, %p3255_p0 }
  0x33   : > { %3265 = shalt.err (!%p3262_p9)
}
  0x34   : > { %2864 = dma.hbm_to_vmem [thread:$0]  (!%p3439_p7), %s4038_s5, 4096, %s294_s20, [#allocation8], %s4046_s28, %s4046_s28, %s4047_s29  }
  0x35   : > { %s28_s25 = ssub.s32 %s3336_s12, %s3465_s22  ;;  %s31_s26 = sadd.s32 1, %s3332_s11 }
  0x36   : > { %p29_p8 = scmp.eq.s32.totalorder %s28_s25, 0  ;;  %p38_p10 = scmp.ne.s32.totalorder %s3332_s11, %s3328_s10 }
  0x37   : > { %p39_p12 = scmp.eq.s32.totalorder %s3336_s12, 0  ;;  %p2872_p11 = scmp.lt.s32.totalorder %s3336_s12, 2 }
  0x38   : > { %s3486_s19 = scalar_select %p29_p8, %s3332_s11, %s31_s26  }
  0x39   : > { %p40_p1 = por %p39_p12, %p38_p10  ;;  %s316_s27 = sand.u32 1, %s3332_s11  }
  0x3a   : > { %s2619_s30 = sshll.u32 %s316_s27, 7  ;;  %s2776_s17 = sshll.u32 %s3336_s12, 11 }
  0x3b   : > { %s3493_s21 = scalar_lea.hbm %s4033_s0, %s2776_s17  ;;  %s320_s20 = scalar_lea.vmem [#allocation2], %s2619_s30 }
  0x3c   : > { %s327_s24 = sshll.u32 %s320_s20, 4  ;;  %p3497_p7 = pnand %p2872_p11, %p40_p1  ;;  %s3495_s24 = int_to_ptr.vmem [resolvable:$true] %s327_s24 }
  0x3d   : > { %s3501_s26 = scalar_lea.sflag [#allocation3], %s316_s27  ;;  %s3266_s13 = scalar_lea.hbm %s3493_s21, 2048 }
  0x3e   : > { %p3267_p13 = scmp.ne.s32.totalorder %s3493_s21, %s3266_s13  ;;  %p3268_p0 = pneg %p3497_p7 }
  0x3f   : > { %s3271_s30 = scalar_lea.hbm %s4033_s0, 4096  ;;  %p3272_p6 = scmp.lt.s32.totalorder %s3493_s21, %s4033_s0 }
  0x40   : > { %p3269_p2 = pnand %p3268_p0, %p3267_p13  ;;  %p3273_p9 = scmp.lt.s32.totalorder %s3271_s30, %s3266_s13 }
  0x42   : > { %p3270_p3 = pneg %p3269_p2  ;;  %p3274_p8 = por %p3273_p9, %p3272_p6 }
  0x44   : > { %p3275_p10 = pnand %p3274_p8, %p3270_p3 }
  0x46   : > { %3278 = shalt.err (!%p3275_p10)
}
  0x47   : > { %s3279_s27 = scalar_lea.vmem %s3495_s24, 2048  ;;  %s3345_s28 = smov [#allocation2]  }
  0x48   : > { %p3280_p12 = scmp.ne.s32.totalorder %s3495_s24, %s3279_s27  ;;  %s3284_s29 = sshll.u32 %s3345_s28, 4  ;;  %s3285_s29 = int_to_ptr.vmem [resolvable:$false] %s3284_s29 }
  0x49   : > { %s3286_s17 = scalar_lea.vmem %s3285_s29, 4096  ;;  %p3287_p13 = scmp.lt.s32.totalorder %s3495_s24, %s3285_s29 }
  0x4a   : > { %p3282_p11 = pnand %p3280_p12, %p3268_p0  ;;  %p3288_p2 = scmp.lt.s32.totalorder %s3286_s17, %s3279_s27 }
  0x4c   : > { %p3283_p1 = pneg %p3282_p11  ;;  %p3289_p4 = por %p3288_p2, %p3287_p13 }
  0x4e   : > { %p3290_p5 = pnand %p3289_p4, %p3283_p1 }
  0x50   : > { %3293 = shalt.err (!%p3290_p5)
}
  0x51   : > { %s4055_s13 = smov 8   ;;  %s4056_s18 = smov 128  }
  0x52   : > { %2868 = dma.hbm_to_vmem [thread:$0]  (!%p3497_p7), %s3493_s21, 2048, %s3495_s24, %s3501_s26, %s4056_s18, %s4056_s18, %s4055_s13  }
  0x53   : > { %p4057_p0 = scmp.ne.s32.totalorder %s4052_s16, 0 }
  0x54   : > { %s341_s28 = sand.u32 (!%p4057_p0), 1, %s3328_s10   ;;  %p4058_p4 = scmp.ne.s32.totalorder (!%p4057_p0), %s4051_s15, 0 }
  0x55   : > { %339 = sbr.rel (%p4057_p0) target bundleno = 1055 (0x41f), region = 56  ;;  %s2623_s29 = sshll.u32 (!%p4057_p0), %s341_s28, 7 }
  0x56   : > { %s342_s30 = scalar_lea.sflag (!%p4057_p0), [#allocation3], %s341_s28  ;;  %s3528_s23 = scalar_lea.vmem (!%p4057_p0), [#allocation2], %s2623_s29 }
  0x5a   : > { %3311 = dma.done.wait (%p4058_p4), %s342_s30, 2048  }
  0x5b   : > { %3313 = vsyncadd (%p4058_p4), %s342_s30, 4294965248  ;;  %p4059_p5 = scmp.ne.s32.totalorder %s4050_s14, 0 }
  0x5d   : > { %3315 = dma.done.wait (%p4059_p5), [#allocation5], 12288  }
  0x5e   : > { %3317 = vsyncadd (%p4059_p5), [#allocation5], 4294955008 }
  0x5f   : > { %3319 = dma.done.wait (%p4059_p5), [#allocation8], 4096  }
  0x60   : > { %3321 = vsyncadd (%p4059_p5), [#allocation8], 4294963200  ;;  %v3346_v0 = vmov 0   ;;  %v2916_v1 = vld [vmem:[#allocation4 + $0xe4] ss:$16 sps:$4 sm:$0xff]   ;;  %v401_v34 = vld [vmem:[%s3528_s23 + $0x8] sm:$0xff] }
  0x61   : > { %670 = vmatprep.mubr.bf16.mxu0 %v3346_v0  ;;  %783 = vmatprep.mubr.bf16.mxu1 %v3346_v0  ;;  %v2918_v2 = vld [vmem:[#allocation4 + $0xec] ss:$16 sps:$4 sm:$0xff]   ;;  %v2920_v3 = vld [vmem:[#allocation4 + $0xe0] ss:$16 sps:$4 sm:$0xff]   ;;  %v2921_v4 = vld [vmem:[#allocation4 + $0xe8] ss:$16 sps:$4 sm:$0xff]  }
  0x62   : > { %638 = vmatprep.subr.bf16.mxu0 %v2916_v1  ;;  %751 = vmatprep.subr.bf16.mxu1 %v2918_v2  ;;  %v2922_v5 = vld [vmem:[#allocation4 + $0xc4] ss:$16 sps:$4 sm:$0xff]   ;;  %v2924_v6 = vld [vmem:[#allocation4 + $0xcc] ss:$16 sps:$4 sm:$0xff]   ;;  %v2926_v7 = vld [vmem:[#allocation4 + $0xc0] ss:$16 sps:$4 sm:$0xff]  }
  0x63   : > { %639 = vmatpush1.bf16.msra.mxu0 %v2920_v3  ;;  %752 = vmatpush1.bf16.msra.mxu1 %v2921_v4  ;;  %v2927_v8 = vld [vmem:[#allocation4 + $0xc8] ss:$16 sps:$4 sm:$0xff]   ;;  %v2928_v9 = vld [vmem:[#allocation4 + $0xa4] ss:$16 sps:$4 sm:$0xff]   ;;  %v2930_v10 = vld [vmem:[#allocation4 + $0xac] ss:$16 sps:$4 sm:$0xff]  }
  0x64   : > { %640 = vmatprep.subr.bf16.mxu0 %v2922_v5  ;;  %753 = vmatprep.subr.bf16.mxu1 %v2924_v6  ;;  %v2932_v11 = vld [vmem:[#allocation4 + $0xa0] ss:$16 sps:$4 sm:$0xff]   ;;  %v2933_v12 = vld [vmem:[#allocation4 + $0xa8] ss:$16 sps:$4 sm:$0xff]   ;;  %v2934_v13 = vld [vmem:[#allocation4 + $0x84] ss:$16 sps:$4 sm:$0xff]  }
  0x65   : > { %v2936_v14 = vld [vmem:[#allocation4 + $0x8c] ss:$16 sps:$4 sm:$0xff]   ;;  %v2938_v15 = vld [vmem:[#allocation4 + $0x80] ss:$16 sps:$4 sm:$0xff]   ;;  %v2939_v16 = vld [vmem:[#allocation4 + $0x88] ss:$16 sps:$4 sm:$0xff]  }
  0x66   : > { %v2940_v17 = vld [vmem:[#allocation4 + $0x64] ss:$16 sps:$4 sm:$0xff]   ;;  %v2942_v18 = vld [vmem:[#allocation4 + $0x6c] ss:$16 sps:$4 sm:$0xff]   ;;  %v2944_v19 = vld [vmem:[#allocation4 + $0x60] ss:$16 sps:$4 sm:$0xff]  }
  0x67   : > { %641 = vmatpush1.bf16.msra.mxu0 %v2926_v7  ;;  %754 = vmatpush1.bf16.msra.mxu1 %v2927_v8  ;;  %v2945_v20 = vld [vmem:[#allocation4 + $0x68] ss:$16 sps:$4 sm:$0xff]   ;;  %v2946_v21 = vld [vmem:[#allocation4 + $0x44] ss:$16 sps:$4 sm:$0xff]   ;;  %v2948_v22 = vld [vmem:[#allocation4 + $0x4c] ss:$16 sps:$4 sm:$0xff]  }
  0x68   : > { %642 = vmatprep.subr.bf16.mxu0 %v2928_v9  ;;  %755 = vmatprep.subr.bf16.mxu1 %v2930_v10  ;;  %v2950_v23 = vld [vmem:[#allocation4 + $0x40] ss:$16 sps:$4 sm:$0xff]   ;;  %v2951_v24 = vld [vmem:[#allocation4 + $0x48] ss:$16 sps:$4 sm:$0xff]   ;;  %v2952_v25 = vld [vmem:[#allocation4 + $0x24] ss:$16 sps:$4 sm:$0xff]  }
  0x69   : > { %v2954_v26 = vld [vmem:[#allocation4 + $0x2c] ss:$16 sps:$4 sm:$0xff]   ;;  %v2956_v27 = vld [vmem:[#allocation4 + $0x20] ss:$16 sps:$4 sm:$0xff]   ;;  %v2957_v28 = vld [vmem:[#allocation4 + $0x28] ss:$16 sps:$4 sm:$0xff]  }
  0x6a   : > { %v2958_v29 = vld [vmem:[#allocation4 + $0x4] ss:$16 sps:$4 sm:$0xff]   ;;  %v2960_v30 = vld [vmem:[#allocation4 + $0xc] ss:$16 sps:$4 sm:$0xff]   ;;  %v2962_v31 = vld [vmem:[#allocation4] ss:$16 sps:$4 sm:$0xff]  }
  0x6b   : > { %643 = vmatpush1.bf16.msra.mxu0 %v2932_v11  ;;  %756 = vmatpush1.bf16.msra.mxu1 %v2933_v12  ;;  %v2963_v32 = vld [vmem:[#allocation4 + $0x8] ss:$16 sps:$4 sm:$0xff]   ;;  %v400_v33 = vld [vmem:[%s3528_s23] sm:$0xff]  ;;  %v2966_v35 = vld [vmem:[#allocation6 + $0x74] ss:$8 sps:$4 sm:$0xff]   ;;  %s4060_s27 = sadd.s32 4294967295, %s3336_s12  }
  0x6c   : > { %644 = vmatprep.subr.bf16.mxu0 %v2934_v13  ;;  %757 = vmatprep.subr.bf16.mxu1 %v2936_v14  ;;  %v2969_v36 = vld [vmem:[#allocation6 + $0x174] ss:$8 sps:$4 sm:$0xff]   ;;  %v416_v37 = vpack.c.bf16 %v401_v34, %v400_v33  ;;  %v2964_v38 = vld [vmem:[#allocation6 + $0x70] ss:$8 sps:$4 sm:$0xff]   ;;  %v2972_v40 = vld [vmem:[#allocation6 + $0x64] ss:$8 sps:$4 sm:$0xff]  }
  0x6d   : > { %v2967_v39 = vld [vmem:[#allocation6 + $0x170] ss:$8 sps:$4 sm:$0xff]   ;;  %v2975_v41 = vld [vmem:[#allocation6 + $0x164] ss:$8 sps:$4 sm:$0xff]   ;;  %v2970_v44 = vld [vmem:[#allocation6 + $0x60] ss:$8 sps:$4 sm:$0xff]  }
  0x6e   : > { %v402_v42 = vld [vmem:[%s3528_s23 + $0x10] sm:$0xff]  ;;  %v403_v43 = vld [vmem:[%s3528_s23 + $0x18] sm:$0xff]  ;;  %v2973_v45 = vld [vmem:[#allocation6 + $0x160] ss:$8 sps:$4 sm:$0xff]   ;;  %s2627_s17 = sshll.u32 %s4060_s27, 4  ;;  %vm2499_vm1 = vcmask 130048  }
  0x6f   : > { %645 = vmatpush1.bf16.msra.mxu0 %v2938_v15  ;;  %758 = vmatpush1.bf16.msra.mxu1 %v2939_v16  ;;  %v2978_v46 = vld [vmem:[#allocation6 + $0x54] ss:$8 sps:$4 sm:$0xff]   ;;  %v417_v48 = vpack.c.bf16 %v403_v43, %v402_v42  ;;  %v2976_v49 = vld [vmem:[#allocation6 + $0x50] ss:$8 sps:$4 sm:$0xff]   ;;  %v2984_v51 = vld [vmem:[#allocation6 + $0x44] ss:$8 sps:$4 sm:$0xff]  }
  0x70   : > { %646 = vmatprep.subr.bf16.mxu0 %v2940_v17  ;;  %759 = vmatprep.subr.bf16.mxu1 %v2942_v18  ;;  %v2981_v47 = vld [vmem:[#allocation6 + $0x154] ss:$8 sps:$4 sm:$0xff]   ;;  %v2979_v50 = vld [vmem:[#allocation6 + $0x150] ss:$8 sps:$4 sm:$0xff]   ;;  %v2987_v52 = vld [vmem:[#allocation6 + $0x144] ss:$8 sps:$4 sm:$0xff]  }
  0x71   : > { %v404_v53 = vld [vmem:[%s3528_s23 + $0x20] sm:$0xff]  ;;  %v405_v54 = vld [vmem:[%s3528_s23 + $0x28] sm:$0xff]  ;;  %v2990_v57 = vld [vmem:[#allocation6 + $0x34] ss:$8 sps:$4 sm:$0xff]   ;;  %p394_p7 = scmp.lt.s32.totalorder %s2627_s17, 31 }
  0x72   : > { %v2982_v55 = vld [vmem:[#allocation6 + $0x40] ss:$8 sps:$4 sm:$0xff]   ;;  %v2993_v58 = vld [vmem:[#allocation6 + $0x134] ss:$8 sps:$4 sm:$0xff]   ;;  %v418_v59 = vpack.c.bf16 %v405_v54, %v404_v53  ;;  %v2988_v60 = vld [vmem:[#allocation6 + $0x30] ss:$8 sps:$4 sm:$0xff]  }
  0x73   : > { %647 = vmatpush1.bf16.msra.mxu0 %v2944_v19  ;;  %760 = vmatpush1.bf16.msra.mxu1 %v2945_v20  ;;  %v2985_v56 = vld [vmem:[#allocation6 + $0x140] ss:$8 sps:$4 sm:$0xff]   ;;  %v2991_v61 = vld [vmem:[#allocation6 + $0x130] ss:$8 sps:$4 sm:$0xff]   ;;  %v2996_v62 = vld [vmem:[#allocation6 + $0x24] ss:$8 sps:$4 sm:$0xff]  }
  0x74   : > { %648 = vmatprep.subr.bf16.mxu0 %v2946_v21  ;;  %761 = vmatprep.subr.bf16.mxu1 %v2948_v22  ;;  %v2999_v63 = vld [vmem:[#allocation6 + $0x124] ss:$8 sps:$4 sm:$0xff]   ;;  %v406_v1 = vld [vmem:[%s3528_s23 + $0x30] sm:$0xff]  ;;  %v407_v2 = vld [vmem:[%s3528_s23 + $0x38] sm:$0xff]  ;;  %s4066_s17 = smov (!%p394_p7, %s2627_s17), 31 }
  0x75   : > { %v2994_v3 = vld [vmem:[#allocation6 + $0x20] ss:$8 sps:$4 sm:$0xff]   ;;  %v3002_v5 = vld [vmem:[#allocation6 + $0x14] ss:$8 sps:$4 sm:$0xff]   ;;  %v419_v7 = vpack.c.bf16 %v407_v2, %v406_v1  ;;  %v3000_v8 = vld [vmem:[#allocation6 + $0x10] ss:$8 sps:$4 sm:$0xff]  }
  0x76   : > { %v2997_v4 = vld [vmem:[#allocation6 + $0x120] ss:$8 sps:$4 sm:$0xff]   ;;  %v3005_v6 = vld [vmem:[#allocation6 + $0x114] ss:$8 sps:$4 sm:$0xff]   ;;  %v3003_v9 = vld [vmem:[#allocation6 + $0x110] ss:$8 sps:$4 sm:$0xff]  }
  0x77   : > { %649 = vmatpush1.bf16.msra.mxu0 %v2950_v23  ;;  %762 = vmatpush1.bf16.msra.mxu1 %v2951_v24  ;;  %v408_v10 = vld [vmem:[%s3528_s23 + $0x40] sm:$0xff]  ;;  %v409_v11 = vld [vmem:[%s3528_s23 + $0x48] sm:$0xff]  ;;  %v3014_v16 = vld [vmem:[#allocation6 + $0xf4] ss:$8 sps:$4 sm:$0xff]   ;;  %s2628_s12 = sshll.u32 %s4066_s17, 3 }
  0x78   : > { %650 = vmatprep.subr.bf16.mxu0 %v2952_v25  ;;  %763 = vmatprep.subr.bf16.mxu1 %v2954_v26  ;;  %v3008_v12 = vld [vmem:[#allocation6 + $0x4] ss:$8 sps:$4 sm:$0xff]   ;;  %v3006_v14 = vld [vmem:[#allocation6] ss:$8 sps:$4 sm:$0xff]   ;;  %v3017_v17 = vld [vmem:[#allocation6 + $0x1f4] ss:$8 sps:$4 sm:$0xff]   ;;  %v420_v18 = vpack.c.bf16 %v409_v11, %v408_v10  ;;  %s3934_s28 = scalar_lea.vmem %s4042_s9, %s2628_s12 }
  0x79   : > { %v3011_v13 = vld [vmem:[#allocation6 + $0x104] ss:$8 sps:$4 sm:$0xff]   ;;  %v3009_v15 = vld [vmem:[#allocation6 + $0x100] ss:$8 sps:$4 sm:$0xff]   ;;  %v3012_v19 = vld [vmem:[#allocation6 + $0xf0] ss:$8 sps:$4 sm:$0xff]  }
  0x7a   : > { %v3015_v20 = vld [vmem:[#allocation6 + $0x1f0] ss:$8 sps:$4 sm:$0xff]   ;;  %v3020_v21 = vld [vmem:[#allocation6 + $0xe4] ss:$8 sps:$4 sm:$0xff]   ;;  %v3018_v25 = vld [vmem:[#allocation6 + $0xe0] ss:$8 sps:$4 sm:$0xff]  }
  0x7b   : > { %651 = vmatpush1.bf16.msra.mxu0 %v2956_v27  ;;  %764 = vmatpush1.bf16.msra.mxu1 %v2957_v28  ;;  %v3023_v22 = vld [vmem:[#allocation6 + $0x1e4] ss:$8 sps:$4 sm:$0xff]   ;;  %v410_v23 = vld [vmem:[%s3528_s23 + $0x50] sm:$0xff]  ;;  %v411_v24 = vld [vmem:[%s3528_s23 + $0x58] sm:$0xff] }
  0x7c   : > { %652 = vmatprep.subr.bf16.mxu0 %v2958_v29  ;;  %765 = vmatprep.subr.bf16.mxu1 %v2960_v30  ;;  %v3021_v26 = vld [vmem:[#allocation6 + $0x1e0] ss:$8 sps:$4 sm:$0xff]   ;;  %v3026_v27 = vld [vmem:[#allocation6 + $0xd4] ss:$8 sps:$4 sm:$0xff]   ;;  %v421_v29 = vpack.c.bf16 %v411_v24, %v410_v23  ;;  %v3024_v30 = vld [vmem:[#allocation6 + $0xd0] ss:$8 sps:$4 sm:$0xff]  }
  0x7d   : > { %v3029_v28 = vld [vmem:[#allocation6 + $0x1d4] ss:$8 sps:$4 sm:$0xff]   ;;  %v3035_v33 = vld [vmem:[#allocation6 + $0x1c4] ss:$8 sps:$4 sm:$0xff]  }
  0x7e   : > { %v412_v34 = vld [vmem:[%s3528_s23 + $0x60] sm:$0xff]  ;;  %v415_v42 = vld [vmem:[%s3528_s23 + $0x78] sm:$0xff] }
  0x7f   : > { %653 = vmatpush1.bf16.msra.mxu0 %v2962_v31  ;;  %766 = vmatpush1.bf16.msra.mxu1 %v2963_v32  ;;  %v3027_v31 = vld [vmem:[#allocation6 + $0x1d0] ss:$8 sps:$4 sm:$0xff]   ;;  %v3032_v32 = vld [vmem:[#allocation6 + $0xc4] ss:$8 sps:$4 sm:$0xff]  }
  0x80   : > { %1420 = vmatprep.subr.bf16.mxu0 %v2966_v35  ;;  %1533 = vmatprep.subr.bf16.mxu1 %v2969_v36  ;;  %v413_v35 = vld [vmem:[%s3528_s23 + $0x68] sm:$0xff] }
  0x81   : > { %v3030_v36 = vld [vmem:[#allocation6 + $0xc0] ss:$8 sps:$4 sm:$0xff]   ;;  %v3056_v53 = vld [vmem:[#allocation6 + $0x84] ss:$8 sps:$4 sm:$0xff]  }
  0x82   : > { %671 = vmatmul.mubr.bf16.vlgmr.msra.gmra.mxu0 %v416_v37  ;;  %784 = vmatmul.mubr.bf16.vlgmr.msra.gmra.mxu1 %v416_v37  ;;  %v3033_v37 = vld [vmem:[#allocation6 + $0x1c0] ss:$8 sps:$4 sm:$0xff]   ;;  %v3059_v54 = vld [vmem:[#allocation6 + $0x184] ss:$8 sps:$4 sm:$0xff]  }
  0x83   : > { %680 = vmatprep.mubr.bf16.mxu0 %v3346_v0  ;;  %793 = vmatprep.mubr.bf16.mxu1 %v3346_v0 }
  0x84   : > { %1421 = vmatpush1.bf16.msra.mxu0 %v2964_v38  ;;  %1534 = vmatpush1.bf16.msra.mxu1 %v2967_v39  ;;  %v3038_v38 = vld [vmem:[#allocation6 + $0xb4] ss:$8 sps:$4 sm:$0xff]   ;;  %v422_v39 = vpack.c.bf16 %v413_v35, %v412_v34 }
  0x85   : > { %1422 = vmatprep.subr.bf16.mxu0 %v2972_v40  ;;  %1535 = vmatprep.subr.bf16.mxu1 %v2975_v41  ;;  %v3036_v40 = vld [vmem:[#allocation6 + $0xb0] ss:$8 sps:$4 sm:$0xff]  }
  0x86   : > { %v414_v41 = vld [vmem:[%s3528_s23 + $0x70] sm:$0xff] }
  0x87   : > { %v423_v43 = vpack.c.bf16 %v415_v42, %v414_v41 }
  0x88   : > { %1423 = vmatpush1.bf16.msra.mxu0 %v2970_v44  ;;  %1536 = vmatpush1.bf16.msra.mxu1 %v2973_v45  ;;  %v3041_v44 = vld [vmem:[#allocation6 + $0x1b4] ss:$8 sps:$4 sm:$0xff]   ;;  %v3039_v45 = vld [vmem:[#allocation6 + $0x1b0] ss:$8 sps:$4 sm:$0xff]  }
  0x89   : > { %1424 = vmatprep.subr.bf16.mxu0 %v2978_v46  ;;  %1537 = vmatprep.subr.bf16.mxu1 %v2981_v47  ;;  %v3044_v46 = vld [vmem:[#allocation6 + $0xa4] ss:$8 sps:$4 sm:$0xff]   ;;  %v3042_v47 = vld [vmem:[#allocation6 + $0xa0] ss:$8 sps:$4 sm:$0xff]  }
  0x8a   : > { %681 = vmatmul.mubr.bf16.gmra.mxu0 %v417_v48  ;;  %794 = vmatmul.mubr.bf16.gmra.mxu1 %v417_v48  ;;  %v3047_v48 = vld [vmem:[#allocation6 + $0x1a4] ss:$8 sps:$4 sm:$0xff]  }
  0x8b   : > { %690 = vmatprep.mubr.bf16.mxu0 %v3346_v0  ;;  %803 = vmatprep.mubr.bf16.mxu1 %v3346_v0 }
  0x8c   : > { %1425 = vmatpush1.bf16.msra.mxu0 %v2976_v49  ;;  %1538 = vmatpush1.bf16.msra.mxu1 %v2979_v50  ;;  %v3045_v49 = vld [vmem:[#allocation6 + $0x1a0] ss:$8 sps:$4 sm:$0xff]   ;;  %v3050_v50 = vld [vmem:[#allocation6 + $0x94] ss:$8 sps:$4 sm:$0xff]  }
  0x8d   : > { %1426 = vmatprep.subr.bf16.mxu0 %v2984_v51  ;;  %1539 = vmatprep.subr.bf16.mxu1 %v2987_v52  ;;  %v3053_v51 = vld [vmem:[#allocation6 + $0x194] ss:$8 sps:$4 sm:$0xff]   ;;  %v3048_v52 = vld [vmem:[#allocation6 + $0x90] ss:$8 sps:$4 sm:$0xff]  }
  0x90   : > { %1427 = vmatpush1.bf16.msra.mxu0 %v2982_v55  ;;  %1540 = vmatpush1.bf16.msra.mxu1 %v2985_v56  ;;  %v3054_v55 = vld [vmem:[#allocation6 + $0x80] ss:$8 sps:$4 sm:$0xff]  }
  0x91   : > { %1428 = vmatprep.subr.bf16.mxu0 %v2990_v57  ;;  %1541 = vmatprep.subr.bf16.mxu1 %v2993_v58  ;;  %v3057_v56 = vld [vmem:[#allocation6 + $0x180] ss:$8 sps:$4 sm:$0xff]   ;;  %v3062_v57 = vld [vmem:[#allocation7 + $0x74] ss:$8 sps:$4 sm:$0xff]   ;;  %v458_v58 = vlaneseq }
  0x92   : > { %691 = vmatmul.mubr.bf16.gmra.mxu0 %v418_v59  ;;  %804 = vmatmul.mubr.bf16.gmra.mxu1 %v418_v59 }
  0x93   : > { %700 = vmatprep.mubr.bf16.mxu0 %v3346_v0  ;;  %813 = vmatprep.mubr.bf16.mxu1 %v3346_v0  ;;  %v459_v59 = vshrl.u32 %v458_v58, 7 }
  0x94   : > { %1429 = vmatpush1.bf16.msra.mxu0 %v2988_v60  ;;  %1542 = vmatpush1.bf16.msra.mxu1 %v2991_v61 }
  0x95   : > { %1430 = vmatprep.subr.bf16.mxu0 %v2996_v62  ;;  %1543 = vmatprep.subr.bf16.mxu1 %v2999_v63  ;;  %v3574_v60 = vsub.s32 0, %v459_v59  ;;  %v3576_v61 = vsub.s32 1, %v459_v59  ;;  %v456_v62 = vld [vmem:[%s4035_s2] sm:$0xf]  ;;  %v472_v63 = vsub.s32 3, %v459_v59  ;;  %v468_v1 = vsub.s32 2, %v459_v59 }
  0x97   : > { %v3582_v2 = vrot.slane %v456_v62, %v3574_v60 }
  0x98   : > { %1431 = vmatpush1.bf16.msra.mxu0 %v2994_v3  ;;  %1544 = vmatpush1.bf16.msra.mxu1 %v2997_v4  ;;  %v3585_v3 = vrot.slane %v456_v62, %v3576_v61 }
  0x99   : > { %1432 = vmatprep.subr.bf16.mxu0 %v3002_v5  ;;  %1545 = vmatprep.subr.bf16.mxu1 %v3005_v6  ;;  %v3587_v6 = vrot.slane %v456_v62, %v472_v63 }
  0x9a   : > { %701 = vmatmul.mubr.bf16.gmra.mxu0 %v419_v7  ;;  %814 = vmatmul.mubr.bf16.gmra.mxu1 %v419_v7  ;;  %v3589_v7 = vrot.slane %v456_v62, %v468_v1  ;;  %v3065_v62 = vld [vmem:[#allocation7 + $0x64] ss:$8 sps:$4 sm:$0xff]  }
  0x9b   : > { %710 = vmatprep.mubr.bf16.mxu0 %v3346_v0  ;;  %823 = vmatprep.mubr.bf16.mxu1 %v3346_v0 }
  0x9c   : > { %1433 = vmatpush1.bf16.msra.mxu0 %v3000_v8  ;;  %1546 = vmatpush1.bf16.msra.mxu1 %v3003_v9 }
  0x9d   : > { %1434 = vmatprep.subr.bf16.mxu0 %v3008_v12  ;;  %1547 = vmatprep.subr.bf16.mxu1 %v3011_v13 }
  0xa0   : > { %1435 = vmatpush1.bf16.msra.mxu0 %v3006_v14  ;;  %1548 = vmatpush1.bf16.msra.mxu1 %v3009_v15 }
  0xa1   : > { %1436 = vmatprep.subr.bf16.mxu0 %v3014_v16  ;;  %1549 = vmatprep.subr.bf16.mxu1 %v3017_v17 }
  0xa2   : > { %711 = vmatmul.mubr.bf16.gmra.mxu0 %v420_v18  ;;  %824 = vmatmul.mubr.bf16.gmra.mxu1 %v420_v18 }
  0xa3   : > { %720 = vmatprep.mubr.bf16.mxu0 %v3346_v0  ;;  %833 = vmatprep.mubr.bf16.mxu1 %v3346_v0 }
  0xa4   : > { %1437 = vmatpush2.bf16.msra.mxu0 %v3012_v19  ;;  %1550 = vmatpush2.bf16.msra.mxu1 %v3015_v20 }
  0xa5   : > { %1438 = vmatprep.subr.bf16.mxu0 %v3020_v21  ;;  %1551 = vmatprep.subr.bf16.mxu1 %v3023_v22 }
  0xa8   : > { %1439 = vmatpush2.bf16.msra.mxu0 %v3018_v25  ;;  %1552 = vmatpush2.bf16.msra.mxu1 %v3021_v26 }
  0xa9   : > { %1440 = vmatprep.subr.bf16.mxu0 %v3026_v27  ;;  %1553 = vmatprep.subr.bf16.mxu1 %v3029_v28 }
  0xaa   : > { %721 = vmatmul.mubr.bf16.gmra.mxu0 %v421_v29  ;;  %834 = vmatmul.mubr.bf16.gmra.mxu1 %v421_v29 }
  0xab   : > { %730 = vmatprep.mubr.bf16.mxu0 %v3346_v0  ;;  %843 = vmatprep.mubr.bf16.mxu1 %v3346_v0 }
  0xac   : > { %1441 = vmatpush2.bf16.msra.mxu0 %v3024_v30  ;;  %1554 = vmatpush2.bf16.msra.mxu1 %v3027_v31 }
  0xad   : > { %1442 = vmatprep.subr.bf16.mxu0 %v3032_v32  ;;  %1555 = vmatprep.subr.bf16.mxu1 %v3035_v33 }
  0xb0   : > { %1443 = vmatpush2.bf16.msra.mxu0 %v3030_v36  ;;  %1556 = vmatpush2.bf16.msra.mxu1 %v3033_v37 }
  0xb1   : > { %1444 = vmatprep.subr.bf16.mxu0 %v3038_v38  ;;  %1557 = vmatprep.subr.bf16.mxu1 %v3041_v44 }
  0xb2   : > { %731 = vmatmul.mubr.bf16.gmra.mxu0 %v422_v39  ;;  %844 = vmatmul.mubr.bf16.gmra.mxu1 %v422_v39 }
  0xb3   : > { %740 = vmatprep.mubr.bf16.mxu0 %v3346_v0  ;;  %853 = vmatprep.mubr.bf16.mxu1 %v3346_v0  ;;  %v3051_v0 = vld [vmem:[#allocation6 + $0x190] ss:$8 sps:$4 sm:$0xff]  }
  0xb4   : > { %1445 = vmatpush2.bf16.msra.mxu0 %v3036_v40  ;;  %1558 = vmatpush2.bf16.msra.mxu1 %v3039_v45 }
  0xb5   : > { %1446 = vmatprep.subr.bf16.mxu0 %v3044_v46  ;;  %1559 = vmatprep.subr.bf16.mxu1 %v3047_v48 }
  0xb8   : > { %1447 = vmatpush2.bf16.msra.mxu0 %v3042_v47  ;;  %1560 = vmatpush2.bf16.msra.mxu1 %v3045_v49 }
  0xb9   : > { %1448 = vmatprep.subr.bf16.mxu0 %v3050_v50  ;;  %1561 = vmatprep.subr.bf16.mxu1 %v3053_v51 }
  0xba   : > { %741 = vmatmul.mubr.bf16.gmra.mxu0 %v423_v43  ;;  %854 = vmatmul.mubr.bf16.gmra.mxu1 %v423_v43 }
  0xbc   : > { %1449 = vmatpush2.bf16.msra.mxu0 %v3048_v52  ;;  %1562 = vmatpush2.bf16.msra.mxu1 %v3051_v0 }
  0xbd   : > { %1450 = vmatprep.subr.bf16.mxu0 %v3056_v53  ;;  %1563 = vmatprep.subr.bf16.mxu1 %v3059_v54 }
  0xc0   : > { %1451 = vmatpush2.bf16.msra.mxu0 %v3054_v55  ;;  %1564 = vmatpush2.bf16.msra.mxu1 %v3057_v56  ;;  %v3060_v55 = vld [vmem:[#allocation7 + $0x70] ss:$8 sps:$4 sm:$0xff]  }
  0xc1   : > { %1930 = vmatprep.subr.bf16.mxu0 %v3062_v57 }
 0x142   : > { %v672_v4 = vpop.f32.mrf.mxu0  ;;  %v785_v5 = vpop.f32.mrf.mxu1 }
 0x143   : > { %v673_v10 = vadd.f32 %v672_v4, %v3582_v2  ;;  %v786_v15 = vadd.f32 %v785_v5, %v3589_v7 }
 0x144   : > { %v674_v8 = vpop.f32.mrf.mxu0  ;;  %v787_v9 = vpop.f32.mrf.mxu1 }
 0x145   : > { %v675_v11 = vadd.f32 %v674_v8, %v3585_v3  ;;  %v788_v12 = vadd.f32 %v787_v9, %v3587_v6  ;;  %v864_v20 = vmul.f32 0.2, %v673_v10  ;;  %v866_v29 = vmul.f32 0.2, %v786_v15 }
 0x146   : > { %v676_v13 = vpop.f32.mrf.mxu0  ;;  %v789_v14 = vpop.f32.mrf.mxu1 }
 0x147   : > { %v677_v16 = vadd.f32 %v676_v13, %v3582_v2  ;;  %v790_v17 = vadd.f32 %v789_v14, %v3589_v7  ;;  %v865_v21 = vmul.f32 0.2, %v675_v11  ;;  %v867_v24 = vmul.f32 0.2, %v788_v12 }
 0x148   : > { %v678_v18 = vpop.f32.mrf.mxu0  ;;  %v791_v19 = vpop.f32.mrf.mxu1  ;;  %v928_v36 = vmax.f32 %v673_v10, %v864_v20  ;;  %v930_v46 = vmax.f32 %v786_v15, %v866_v29  ;;  %v3063_v15 = vld [vmem:[#allocation7 + $0x60] ss:$8 sps:$4 sm:$0xff]   ;;  %v3068_v20 = vld [vmem:[#allocation7 + $0x54] ss:$8 sps:$4 sm:$0xff]  }
 0x149   : > { %v679_v22 = vadd.f32 %v678_v18, %v3585_v3  ;;  %v792_v23 = vadd.f32 %v791_v19, %v3587_v6  ;;  %v868_v25 = vmul.f32 0.2, %v677_v16  ;;  %v870_v26 = vmul.f32 0.2, %v790_v17 }
 0x14a   : > { %v682_v27 = vpop.f32.mrf.mxu0  ;;  %v795_v28 = vpop.f32.mrf.mxu1  ;;  %v929_v40 = vmax.f32 %v675_v11, %v865_v21  ;;  %v931_v41 = vmax.f32 %v788_v12, %v867_v24 }
 0x14b   : > { %v869_v30 = vmul.f32 0.2, %v679_v22  ;;  %v871_v31 = vmul.f32 0.2, %v792_v23  ;;  %v932_v32 = vmax.f32 %v677_v16, %v868_v25  ;;  %v3600_v33 = vadd.f32 %v682_v27, %v3582_v2 }
 0x14c   : > { %v684_v34 = vpop.f32.mrf.mxu0  ;;  %v797_v35 = vpop.f32.mrf.mxu1  ;;  %v934_v37 = vmax.f32 %v790_v17, %v870_v26  ;;  %v3605_v47 = vadd.f32 %v795_v28, %v3589_v7 }
 0x14d   : > { %v933_v38 = vmax.f32 %v679_v22, %v869_v30  ;;  %v935_v39 = vmax.f32 %v792_v23, %v871_v31  ;;  %v685_v42 = vadd.f32 %v684_v34, %v3585_v3  ;;  %v798_v43 = vadd.f32 %v797_v35, %v3587_v6 }
 0x14e   : > { %v686_v44 = vpop.f32.mrf.mxu0  ;;  %v799_v45 = vpop.f32.mrf.mxu1  ;;  %v992_v50 = vpack.c.bf16 %v932_v32, %v928_v36  ;;  %v872_v51 = vmul.f32 0.2, %v3600_v33  ;;  %v994_v56 = vpack.c.bf16 %v934_v37, %v930_v46  ;;  %v874_v11 = vmul.f32 0.2, %v3605_v47  ;;  %v3066_v36 = vld [vmem:[#allocation7 + $0x50] ss:$8 sps:$4 sm:$0xff]  }
 0x14f   : > { %v687_v48 = vadd.f32 %v686_v44, %v3582_v2  ;;  %v3609_v49 = vadd.f32 %v799_v45, %v3589_v7  ;;  %v993_v53 = vpack.c.bf16 %v933_v38, %v929_v40  ;;  %v995_v54 = vpack.c.bf16 %v935_v39, %v931_v41  ;;  %v3071_v37 = vld [vmem:[#allocation7 + $0x44] ss:$8 sps:$4 sm:$0xff]  }
 0x150   : > { %v688_v52 = vpop.f32.mrf.mxu0  ;;  %v801_v0 = vpop.f32.mrf.mxu1  ;;  %v873_v63 = vmul.f32 0.2, %v685_v42  ;;  %v875_v1 = vmul.f32 0.2, %v798_v43  ;;  %v936_v21 = vmax.f32 %v3600_v33, %v872_v51  ;;  %v938_v31 = vmax.f32 %v3605_v47, %v874_v11 }
 0x151   : > { %v876_v57 = vmul.f32 0.2, %v687_v48  ;;  %v689_v58 = vadd.f32 %v688_v52, %v3585_v3  ;;  %v802_v59 = vadd.f32 %v801_v0, %v3587_v6  ;;  %v878_v4 = vmul.f32 0.2, %v3609_v49  ;;  %1452 = vmatprep.mubr.bf16.mxu0 %v993_v53  ;;  %1565 = vmatprep.mubr.bf16.mxu1 %v995_v54  ;;  %v3069_v54 = vld [vmem:[#allocation7 + $0x40] ss:$8 sps:$4 sm:$0xff]  }
 0x152   : > { %v692_v5 = vpop.f32.mrf.mxu0  ;;  %v805_v8 = vpop.f32.mrf.mxu1  ;;  %1453 = vmatmul.mubr.bf16.vlgmr.msra.gmra.mxu0 %v992_v50  ;;  %1566 = vmatmul.mubr.bf16.vlgmr.msra.gmra.mxu1 %v994_v56  ;;  %v937_v22 = vmax.f32 %v685_v42, %v873_v63  ;;  %v939_v23 = vmax.f32 %v798_v43, %v875_v1 }
 0x153   : > { %v877_v9 = vmul.f32 0.2, %v689_v58  ;;  %v879_v10 = vmul.f32 0.2, %v802_v59  ;;  %v940_v12 = vmax.f32 %v687_v48, %v876_v57  ;;  %1931 = vmatpush1.bf16.msra.mxu0 %v3060_v55  ;;  %v942_v24 = vmax.f32 %v3609_v49, %v878_v4 }
 0x154   : > { %v694_v13 = vpop.f32.mrf.mxu0  ;;  %v807_v14 = vpop.f32.mrf.mxu1  ;;  %1932 = vmatprep.subr.bf16.mxu0 %v3065_v62  ;;  %v3625_v27 = vadd.f32 %v692_v5, %v3582_v2  ;;  %v3628_v28 = vadd.f32 %v805_v8, %v3589_v7 }
 0x155   : > { %v941_v16 = vmax.f32 %v689_v58, %v877_v9  ;;  %v943_v17 = vmax.f32 %v802_v59, %v879_v10  ;;  %v3617_v18 = vadd.f32 %v694_v13, %v3585_v3  ;;  %v3620_v19 = vadd.f32 %v807_v14, %v3587_v6  ;;  %v3074_v59 = vld [vmem:[#allocation7 + $0x34] ss:$8 sps:$4 sm:$0xff]  }
 0x156   : > { %v696_v25 = vpop.f32.mrf.mxu0  ;;  %v809_v26 = vpop.f32.mrf.mxu1  ;;  %v996_v41 = vpack.c.bf16 %v940_v12, %v936_v21  ;;  %v998_v47 = vpack.c.bf16 %v942_v24, %v938_v31  ;;  %v880_v48 = vmul.f32 0.2, %v3625_v27  ;;  %v882_v49 = vmul.f32 0.2, %v3628_v28  ;;  %v3077_v24 = vld [vmem:[#allocation7 + $0x24] ss:$8 sps:$4 sm:$0xff]  }
 0x157   : > { %v697_v29 = vadd.f32 %v696_v25, %v3582_v2  ;;  %v3632_v30 = vadd.f32 %v809_v26, %v3589_v7  ;;  %v997_v34 = vpack.c.bf16 %v941_v16, %v937_v22  ;;  %v999_v35 = vpack.c.bf16 %v943_v17, %v939_v23  ;;  %1933 = vmatpush1.bf16.msra.mxu0 %v3063_v15 }
 0x158   : > { %v698_v32 = vpop.f32.mrf.mxu0  ;;  %v811_v33 = vpop.f32.mrf.mxu1  ;;  %v881_v38 = vmul.f32 0.2, %v3617_v18  ;;  %v883_v39 = vmul.f32 0.2, %v3620_v19  ;;  %1934 = vmatprep.subr.bf16.mxu0 %v3068_v20  ;;  %v944_v9 = vmax.f32 %v3625_v27, %v880_v48  ;;  %v946_v10 = vmax.f32 %v3628_v28, %v882_v49 }
 0x159   : > { %v884_v40 = vmul.f32 0.2, %v697_v29  ;;  %v886_v42 = vmul.f32 0.2, %v3632_v30  ;;  %v699_v43 = vadd.f32 %v698_v32, %v3585_v3  ;;  %v812_v44 = vadd.f32 %v811_v33, %v3587_v6  ;;  %1462 = vmatprep.mubr.bf16.mxu0 %v997_v34  ;;  %1575 = vmatprep.mubr.bf16.mxu1 %v999_v35 }
 0x15a   : > { %v702_v45 = vpop.f32.mrf.mxu0  ;;  %v815_v46 = vpop.f32.mrf.mxu1  ;;  %1463 = vmatmul.mubr.bf16.gmra.mxu0 %v996_v41  ;;  %1576 = vmatmul.mubr.bf16.gmra.mxu1 %v998_v47  ;;  %v945_v55 = vmax.f32 %v3617_v18, %v881_v38  ;;  %v947_v56 = vmax.f32 %v3620_v19, %v883_v39  ;;  %v3072_v19 = vld [vmem:[#allocation7 + $0x30] ss:$8 sps:$4 sm:$0xff]  }
 0x15b   : > { %v3643_v50 = vadd.f32 %v702_v45, %v3582_v2  ;;  %v885_v51 = vmul.f32 0.2, %v699_v43  ;;  %v887_v52 = vmul.f32 0.2, %v812_v44  ;;  %1935 = vmatpush1.bf16.msra.mxu0 %v3066_v36  ;;  %v948_v57 = vmax.f32 %v697_v29, %v884_v40 }
 0x15c   : > { %v704_v0 = vpop.f32.mrf.mxu0  ;;  %v817_v53 = vpop.f32.mrf.mxu1  ;;  %1936 = vmatprep.subr.bf16.mxu0 %v3071_v37  ;;  %v950_v62 = vmax.f32 %v3632_v30, %v886_v42  ;;  %v3656_v12 = vadd.f32 %v815_v46, %v3589_v7  ;;  %v3075_v37 = vld [vmem:[#allocation7 + $0x20] ss:$8 sps:$4 sm:$0xff]   ;;  %v3080_v42 = vld [vmem:[#allocation7 + $0x14] ss:$8 sps:$4 sm:$0xff]  }
 0x15d   : > { %v3648_v58 = vadd.f32 %v704_v0, %v3585_v3  ;;  %v949_v63 = vmax.f32 %v699_v43, %v885_v51  ;;  %v951_v1 = vmax.f32 %v812_v44, %v887_v52  ;;  %v818_v4 = vadd.f32 %v817_v53, %v3587_v6 }
 0x15e   : > { %v706_v5 = vpop.f32.mrf.mxu0  ;;  %v819_v8 = vpop.f32.mrf.mxu1  ;;  %v888_v11 = vmul.f32 0.2, %v3643_v50  ;;  %v1000_v23 = vpack.c.bf16 %v948_v57, %v944_v9  ;;  %v1002_v30 = vpack.c.bf16 %v950_v62, %v946_v10  ;;  %v890_v31 = vmul.f32 0.2, %v3656_v12 }
 0x15f   : > { %v707_v13 = vadd.f32 %v706_v5, %v3582_v2  ;;  %v3660_v14 = vadd.f32 %v819_v8, %v3589_v7  ;;  %v1001_v17 = vpack.c.bf16 %v949_v63, %v945_v55  ;;  %v1003_v18 = vpack.c.bf16 %v951_v1, %v947_v56  ;;  %1937 = vmatpush1.bf16.msra.mxu0 %v3069_v54 }
 0x160   : > { %v708_v15 = vpop.f32.mrf.mxu0  ;;  %v821_v16 = vpop.f32.mrf.mxu1  ;;  %v889_v20 = vmul.f32 0.2, %v3648_v58  ;;  %1938 = vmatprep.subr.bf16.mxu0 %v3074_v59  ;;  %v891_v25 = vmul.f32 0.2, %v818_v4  ;;  %v952_v49 = vmax.f32 %v3643_v50, %v888_v11  ;;  %v954_v51 = vmax.f32 %v3656_v12, %v890_v31  ;;  %v3078_v59 = vld [vmem:[#allocation7 + $0x10] ss:$8 sps:$4 sm:$0xff]  }
 0x161   : > { %v709_v21 = vadd.f32 %v708_v15, %v3585_v3  ;;  %v822_v22 = vadd.f32 %v821_v16, %v3587_v6  ;;  %v892_v26 = vmul.f32 0.2, %v707_v13  ;;  %v894_v27 = vmul.f32 0.2, %v3660_v14  ;;  %1472 = vmatprep.mubr.bf16.mxu0 %v1001_v17  ;;  %1585 = vmatprep.mubr.bf16.mxu1 %v1003_v18 }
 0x162   : > { %v712_v28 = vpop.f32.mrf.mxu0  ;;  %v825_v29 = vpop.f32.mrf.mxu1  ;;  %1473 = vmatmul.mubr.bf16.gmra.mxu0 %v1000_v23  ;;  %1586 = vmatmul.mubr.bf16.gmra.mxu1 %v1002_v30  ;;  %v953_v38 = vmax.f32 %v3648_v58, %v889_v20  ;;  %v955_v43 = vmax.f32 %v818_v4, %v891_v25  ;;  %v3083_v4 = vld [vmem:[#allocation7 + $0x4] ss:$8 sps:$4 sm:$0xff]  }
 0x163   : > { %v893_v32 = vmul.f32 0.2, %v709_v21  ;;  %v895_v33 = vmul.f32 0.2, %v822_v22  ;;  %v3668_v34 = vadd.f32 %v712_v28, %v3582_v2  ;;  %1939 = vmatpush1.bf16.msra.mxu0 %v3072_v19  ;;  %v956_v39 = vmax.f32 %v707_v13, %v892_v26  ;;  %v3081_v19 = vld [vmem:[#allocation7] ss:$8 sps:$4 sm:$0xff]  }
 0x164   : > { %v714_v35 = vpop.f32.mrf.mxu0  ;;  %v827_v36 = vpop.f32.mrf.mxu1  ;;  %1940 = vmatprep.subr.bf16.mxu0 %v3077_v24  ;;  %v958_v44 = vmax.f32 %v3660_v14, %v894_v27  ;;  %v3682_v54 = vadd.f32 %v825_v29, %v3589_v7  ;;  %v3086_v24 = vld [vmem:[#allocation7 + $0xf4] ss:$8 sps:$4 sm:$0xff]  }
 0x165   : > { %v957_v40 = vmax.f32 %v709_v21, %v893_v32  ;;  %v959_v41 = vmax.f32 %v822_v22, %v895_v33  ;;  %v715_v45 = vadd.f32 %v714_v35, %v3585_v3  ;;  %v828_v46 = vadd.f32 %v827_v36, %v3587_v6 }
 0x166   : > { %v716_v47 = vpop.f32.mrf.mxu0  ;;  %v829_v48 = vpop.f32.mrf.mxu1  ;;  %v896_v53 = vmul.f32 0.2, %v3668_v34  ;;  %v1004_v1 = vpack.c.bf16 %v956_v39, %v952_v49  ;;  %v1006_v12 = vpack.c.bf16 %v958_v44, %v954_v51  ;;  %v898_v15 = vmul.f32 0.2, %v3682_v54 }
 0x167   : > { %v717_v52 = vadd.f32 %v716_v47, %v3582_v2  ;;  %v3678_v0 = vadd.f32 %v829_v48, %v3589_v7  ;;  %v1005_v57 = vpack.c.bf16 %v957_v40, %v953_v38  ;;  %v1007_v58 = vpack.c.bf16 %v959_v41, %v955_v43  ;;  %1941 = vmatpush1.bf16.msra.mxu0 %v3075_v37  ;;  %v3084_v40 = vld [vmem:[#allocation7 + $0xf0] ss:$8 sps:$4 sm:$0xff]   ;;  %v3089_v41 = vld [vmem:[#allocation7 + $0xe4] ss:$8 sps:$4 sm:$0xff]  }
 0x168   : > { %v718_v55 = vpop.f32.mrf.mxu0  ;;  %v831_v56 = vpop.f32.mrf.mxu1  ;;  %1942 = vmatprep.subr.bf16.mxu0 %v3080_v42  ;;  %v897_v5 = vmul.f32 0.2, %v715_v45  ;;  %v899_v8 = vmul.f32 0.2, %v828_v46  ;;  %v960_v25 = vmax.f32 %v3668_v34, %v896_v53  ;;  %v962_v34 = vmax.f32 %v3682_v54, %v898_v15 }
 0x169   : > { %v900_v62 = vmul.f32 0.2, %v717_v52  ;;  %v719_v50 = vadd.f32 %v718_v55, %v3585_v3  ;;  %v832_v63 = vadd.f32 %v831_v56, %v3587_v6  ;;  %v902_v9 = vmul.f32 0.2, %v3678_v0  ;;  %1482 = vmatprep.mubr.bf16.mxu0 %v1005_v57  ;;  %1595 = vmatprep.mubr.bf16.mxu1 %v1007_v58 }
 0x16a   : > { %v722_v10 = vpop.f32.mrf.mxu0  ;;  %v835_v11 = vpop.f32.mrf.mxu1  ;;  %1483 = vmatmul.mubr.bf16.gmra.mxu0 %v1004_v1  ;;  %1596 = vmatmul.mubr.bf16.gmra.mxu1 %v1006_v12  ;;  %v961_v26 = vmax.f32 %v715_v45, %v897_v5  ;;  %v963_v27 = vmax.f32 %v828_v46, %v899_v8  ;;  %v3092_v5 = vld [vmem:[#allocation7 + $0xd4] ss:$8 sps:$4 sm:$0xff]  }
 0x16b   : > { %v901_v13 = vmul.f32 0.2, %v719_v50  ;;  %v903_v14 = vmul.f32 0.2, %v832_v63  ;;  %v964_v16 = vmax.f32 %v717_v52, %v900_v62  ;;  %1943 = vmatpush1.bf16.msra.mxu0 %v3078_v59  ;;  %v966_v28 = vmax.f32 %v3678_v0, %v902_v9  ;;  %v3087_v62 = vld [vmem:[#allocation7 + $0xe0] ss:$8 sps:$4 sm:$0xff]  }
 0x16c   : > { %v724_v17 = vpop.f32.mrf.mxu0  ;;  %v837_v18 = vpop.f32.mrf.mxu1  ;;  %1944 = vmatprep.subr.bf16.mxu0 %v3083_v4  ;;  %v3697_v31 = vadd.f32 %v722_v10, %v3582_v2  ;;  %v3700_v32 = vadd.f32 %v835_v11, %v3589_v7 }
 0x16d   : > { %v965_v20 = vmax.f32 %v719_v50, %v901_v13  ;;  %v967_v21 = vmax.f32 %v832_v63, %v903_v14  ;;  %v3689_v22 = vadd.f32 %v724_v17, %v3585_v3  ;;  %v3692_v23 = vadd.f32 %v837_v18, %v3587_v6 }
 0x16e   : > { %v726_v29 = vpop.f32.mrf.mxu0  ;;  %v839_v30 = vpop.f32.mrf.mxu1  ;;  %v1008_v45 = vpack.c.bf16 %v964_v16, %v960_v25  ;;  %v1010_v52 = vpack.c.bf16 %v966_v28, %v962_v34  ;;  %v904_v0 = vmul.f32 0.2, %v3697_v31  ;;  %v906_v53 = vmul.f32 0.2, %v3700_v32 }
 0x16f   : > { %v3703_v33 = vadd.f32 %v726_v29, %v3582_v2  ;;  %v3706_v35 = vadd.f32 %v839_v30, %v3589_v7  ;;  %v1009_v38 = vpack.c.bf16 %v965_v20, %v961_v26  ;;  %v1011_v39 = vpack.c.bf16 %v967_v21, %v963_v27  ;;  %1945 = vmatpush1.bf16.msra.mxu0 %v3081_v19  ;;  %v3095_v29 = vld [vmem:[#allocation7 + $0xc4] ss:$8 sps:$4 sm:$0xff]  }
 0x170   : > { %v728_v36 = vpop.f32.mrf.mxu0  ;;  %v841_v37 = vpop.f32.mrf.mxu1  ;;  %v905_v42 = vmul.f32 0.2, %v3689_v22  ;;  %v907_v43 = vmul.f32 0.2, %v3692_v23  ;;  %1946 = vmatprep.subr.bf16.mxu0 %v3086_v24  ;;  %v968_v14 = vmax.f32 %v3697_v31, %v904_v0  ;;  %v970_v15 = vmax.f32 %v3700_v32, %v906_v53  ;;  %v3090_v24 = vld [vmem:[#allocation7 + $0xd0] ss:$8 sps:$4 sm:$0xff]  }
 0x171   : > { %v908_v44 = vmul.f32 0.2, %v3703_v33  ;;  %v910_v46 = vmul.f32 0.2, %v3706_v35  ;;  %v729_v47 = vadd.f32 %v728_v36, %v3585_v3  ;;  %v842_v48 = vadd.f32 %v841_v37, %v3587_v6  ;;  %1492 = vmatprep.mubr.bf16.mxu0 %v1009_v38  ;;  %1605 = vmatprep.mubr.bf16.mxu1 %v1011_v39 }
 0x172   : > { %v732_v49 = vpop.f32.mrf.mxu0  ;;  %v845_v51 = vpop.f32.mrf.mxu1  ;;  %1493 = vmatmul.mubr.bf16.gmra.mxu0 %v1008_v45  ;;  %1606 = vmatmul.mubr.bf16.gmra.mxu1 %v1010_v52  ;;  %v969_v50 = vmax.f32 %v3689_v22, %v905_v42  ;;  %v971_v63 = vmax.f32 %v3692_v23, %v907_v43  ;;  %v3093_v42 = vld [vmem:[#allocation7 + $0xc0] ss:$8 sps:$4 sm:$0xff]  }
 0x173   : > { %v3718_v54 = vadd.f32 %v732_v49, %v3582_v2  ;;  %v3721_v55 = vadd.f32 %v845_v51, %v3589_v7  ;;  %v909_v56 = vmul.f32 0.2, %v729_v47  ;;  %v911_v57 = vmul.f32 0.2, %v842_v48  ;;  %1947 = vmatpush2.bf16.msra.mxu0 %v3084_v40 }
 0x174   : > { %v734_v58 = vpop.f32.mrf.mxu0  ;;  %v847_v59 = vpop.f32.mrf.mxu1  ;;  %v972_v1 = vmax.f32 %v3703_v33, %v908_v44  ;;  %1948 = vmatprep.subr.bf16.mxu0 %v3089_v41  ;;  %v974_v8 = vmax.f32 %v3706_v35, %v910_v46 }
 0x175   : > { %v3727_v4 = vadd.f32 %v734_v58, %v3585_v3  ;;  %v973_v9 = vmax.f32 %v729_v47, %v909_v56  ;;  %v975_v10 = vmax.f32 %v842_v48, %v911_v57  ;;  %v848_v11 = vadd.f32 %v847_v59, %v3587_v6 }
 0x176   : > { %v736_v12 = vpop.f32.mrf.mxu0  ;;  %v849_v13 = vpop.f32.mrf.mxu1  ;;  %v912_v16 = vmul.f32 0.2, %v3718_v54  ;;  %v3735_v17 = vmul.f32 0.2, %v3721_v55  ;;  %v1012_v28 = vpack.c.bf16 %v972_v1, %v968_v14  ;;  %v1014_v34 = vpack.c.bf16 %v974_v8, %v970_v15 }
 0x177   : > { %v737_v18 = vadd.f32 %v736_v12, %v3582_v2  ;;  %v850_v19 = vadd.f32 %v849_v13, %v3589_v7  ;;  %v1013_v22 = vpack.c.bf16 %v973_v9, %v969_v50  ;;  %v1015_v23 = vpack.c.bf16 %v975_v10, %v971_v63  ;;  %1949 = vmatpush2.bf16.msra.mxu0 %v3087_v62 }
 0x178   : > { %v738_v20 = vpop.f32.mrf.mxu0  ;;  %v851_v21 = vpop.f32.mrf.mxu1  ;;  %v913_v25 = vmul.f32 0.2, %v3727_v4  ;;  %1950 = vmatprep.subr.bf16.mxu0 %v3092_v5  ;;  %v915_v30 = vmul.f32 0.2, %v848_v11  ;;  %v976_v38 = vmax.f32 %v3718_v54, %v912_v16  ;;  %v978_v43 = vmax.f32 %v3721_v55, %v3735_v17 }
 0x179   : > { %v739_v26 = vadd.f32 %v738_v20, %v3585_v3  ;;  %v852_v27 = vadd.f32 %v851_v21, %v3587_v6  ;;  %v916_v31 = vmul.f32 0.2, %v737_v18  ;;  %v918_v32 = vmul.f32 0.2, %v850_v19  ;;  %1502 = vmatprep.mubr.bf16.mxu0 %v1013_v22  ;;  %1615 = vmatprep.mubr.bf16.mxu1 %v1015_v23  ;;  %v3098_v23 = vld [vmem:[#allocation7 + $0xb4] ss:$8 sps:$4 sm:$0xff]  }
 0x17a   : > { %v742_v33 = vpop.f32.mrf.mxu0  ;;  %v855_v35 = vpop.f32.mrf.mxu1  ;;  %1503 = vmatmul.mubr.bf16.gmra.mxu0 %v1012_v28  ;;  %1616 = vmatmul.mubr.bf16.gmra.mxu1 %v1014_v34  ;;  %v977_v44 = vmax.f32 %v3727_v4, %v913_v25  ;;  %v979_v47 = vmax.f32 %v848_v11, %v915_v30  ;;  %v3101_v25 = vld [vmem:[#allocation7 + $0xa4] ss:$8 sps:$4 sm:$0xff]   ;;  %v3102_v28 = vld [vmem:[#allocation7 + $0x90] ss:$8 sps:$4 sm:$0xff]   ;;  %v3105_v30 = vld [vmem:[#allocation7 + $0x80] ss:$8 sps:$4 sm:$0xff]  }
 0x17b   : > { %v917_v36 = vmul.f32 0.2, %v739_v26  ;;  %v919_v37 = vmul.f32 0.2, %v852_v27  ;;  %v980_v39 = vmax.f32 %v737_v18, %v916_v31  ;;  %1951 = vmatpush2.bf16.msra.mxu0 %v3090_v24  ;;  %v982_v48 = vmax.f32 %v850_v19, %v918_v32  ;;  %v3096_v24 = vld [vmem:[#allocation7 + $0xb0] ss:$8 sps:$4 sm:$0xff]  }
 0x17c   : > { %v744_v40 = vpop.f32.mrf.mxu0  ;;  %v857_v41 = vpop.f32.mrf.mxu1  ;;  %1952 = vmatprep.subr.bf16.mxu0 %v3095_v29  ;;  %v743_v53 = vadd.f32 %v742_v33, %v3582_v2  ;;  %v856_v54 = vadd.f32 %v855_v35, %v3589_v7  ;;  %v3107_v29 = vld [vmem:[#allocation7 + $0x84] ss:$8 sps:$4 sm:$0xff]   ;;  %v3108_v31 = vld [vmem:[%s4040_s7 + $0x78] sm:$0xff]   ;;  %v3110_v33 = vld [vmem:[%s4040_s7 + $0x70] sm:$0xff]  }
 0x17d   : > { %v981_v45 = vmax.f32 %v739_v26, %v917_v36  ;;  %v983_v46 = vmax.f32 %v852_v27, %v919_v37  ;;  %v745_v49 = vadd.f32 %v744_v40, %v3585_v3  ;;  %v858_v51 = vadd.f32 %v857_v41, %v3587_v6  ;;  %v3099_v26 = vld [vmem:[#allocation7 + $0xa0] ss:$8 sps:$4 sm:$0xff]   ;;  %v3104_v27 = vld [vmem:[#allocation7 + $0x94] ss:$8 sps:$4 sm:$0xff]   ;;  %2777 = vmatprep.subr.bf16.mxu1 %v3108_v31 }
 0x17e   : > { %v746_v52 = vpop.f32.mrf.mxu0  ;;  %v859_v0 = vpop.f32.mrf.mxu1  ;;  %v1016_v63 = vpack.c.bf16 %v980_v39, %v976_v38  ;;  %v1018_v10 = vpack.c.bf16 %v982_v48, %v978_v43  ;;  %v922_v12 = vmul.f32 0.2, %v856_v54  ;;  %v3109_v32 = vld [vmem:[%s4040_s7 + $0x38] sm:$0xff]   ;;  %v3111_v35 = vld [vmem:[%s4040_s7 + $0x30] sm:$0xff]   ;;  %v3112_v34 = vld [vmem:[%s4040_s7 + $0x68] sm:$0xff]  }
 0x17f   : > { %v747_v56 = vadd.f32 %v746_v52, %v3582_v2  ;;  %v860_v55 = vadd.f32 %v859_v0, %v3589_v7  ;;  %v921_v57 = vmul.f32 0.2, %v745_v49  ;;  %v1017_v62 = vpack.c.bf16 %v981_v45, %v977_v44  ;;  %1953 = vmatpush2.bf16.msra.mxu0 %v3093_v42  ;;  %2778 = vmatpush3.bf16.msra.mxu1 %v3109_v32  ;;  %v3113_v36 = vld [vmem:[%s4040_s7 + $0x28] sm:$0xff]   ;;  %v3114_v37 = vld [vmem:[%s4040_s7 + $0x60] sm:$0xff]   ;;  %v3116_v39 = vld [vmem:[%s4040_s7 + $0x58] sm:$0xff]  }
 0x180   : > { %v748_v58 = vpop.f32.mrf.mxu0  ;;  %v861_v59 = vpop.f32.mrf.mxu1  ;;  %v1019_v50 = vpack.c.bf16 %v983_v46, %v979_v47  ;;  %v923_v1 = vmul.f32 0.2, %v858_v51  ;;  %v920_v2 = vmul.f32 0.2, %v743_v53  ;;  %1954 = vmatprep.subr.bf16.mxu0 %v3098_v23  ;;  %2779 = vmatprep.subr.bf16.mxu1 %v3110_v33  ;;  %v3115_v38 = vld [vmem:[%s4040_s7 + $0x20] sm:$0xff]   ;;  %v3117_v40 = vld [vmem:[%s4040_s7 + $0x18] sm:$0xff]  }
 0x181   : > { %v924_v4 = vmul.f32 0.2, %v747_v56  ;;  %v749_v5 = vadd.f32 %v748_v58, %v3585_v3  ;;  %v862_v8 = vadd.f32 %v861_v59, %v3587_v6  ;;  %v926_v9 = vmul.f32 0.2, %v860_v55  ;;  %1512 = vmatprep.mubr.bf16.mxu0 %v1017_v62  ;;  %v3118_v41 = vld [vmem:[%s4040_s7 + $0x50] sm:$0xff]   ;;  %v3120_v43 = vld [vmem:[%s4040_s7 + $0x48] sm:$0xff]  }
 0x182   : > { %1625 = vmatprep.mubr.bf16.mxu1 %v1019_v50  ;;  %1513 = vmatmul.mubr.bf16.gmra.mxu0 %v1016_v63  ;;  %v985_v13 = vmax.f32 %v745_v49, %v921_v57  ;;  %v987_v14 = vmax.f32 %v858_v51, %v923_v1  ;;  %v984_v19 = vmax.f32 %v743_v53, %v920_v2  ;;  %v3119_v42 = vld [vmem:[%s4040_s7 + $0x10] sm:$0xff]   ;;  %v1088_v44 = vld [vmem:[%s4037_s4] sm:$0x3] }
 0x183   : > { %v925_v11 = vmul.f32 0.2, %v749_v5  ;;  %v927_v7 = vmul.f32 0.2, %v862_v8  ;;  %1626 = vmatmul.mubr.bf16.gmra.mxu1 %v1018_v10  ;;  %v988_v15 = vmax.f32 %v747_v56, %v924_v4  ;;  %v990_v18 = vmax.f32 %v860_v55, %v926_v9  ;;  %1955 = vmatpush2.bf16.msra.mxu0 %v3096_v24 }
 0x184   : > { %v986_v6 = vmax.f32 %v856_v54, %v922_v12  ;;  %1956 = vmatprep.subr.bf16.mxu0 %v3101_v25  ;;  %2780 = vmatpush3.bf16.msra.mxu1 %v3111_v35  ;;  %v3797_v45 = vrot.slane %v1088_v44, %v3574_v60  ;;  %v3800_v46 = vrot.slane %v1088_v44, %v3576_v61 }
 0x185   : > { %v989_v16 = vmax.f32 %v749_v5, %v925_v11  ;;  %v991_v17 = vmax.f32 %v862_v8, %v927_v7  ;;  %v1020_v21 = vpack.c.bf16 %v988_v15, %v984_v19  ;;  %2781 = vmatprep.subr.bf16.mxu1 %v3112_v34 }
 0x186   : > { %v1022_v22 = vpack.c.bf16 %v990_v18, %v986_v6 }
 0x187   : > { %v1021_v3 = vpack.c.bf16 %v989_v16, %v985_v13  ;;  %v1023_v20 = vpack.c.bf16 %v991_v17, %v987_v14  ;;  %1957 = vmatpush2.bf16.msra.mxu0 %v3099_v26 }
 0x188   : > { %1958 = vmatprep.subr.bf16.mxu0 %v3104_v27  ;;  %2782 = vmatpush3.bf16.msra.mxu1 %v3113_v36 }
 0x189   : > { %1522 = vmatprep.mubr.bf16.mxu0 %v1021_v3  ;;  %1635 = vmatprep.mubr.bf16.mxu1 %v1023_v20 }
 0x18a   : > { %1523 = vmatmul.mubr.bf16.gmra.mxu0 %v1020_v21  ;;  %2783 = vmatprep.subr.bf16.mxu1 %v3114_v37 }
 0x18b   : > { %1636 = vmatmul.mubr.bf16.gmra.mxu1 %v1022_v22  ;;  %1959 = vmatpush2.bf16.msra.mxu0 %v3102_v28 }
 0x18c   : > { %1960 = vmatprep.subr.bf16.mxu0 %v3107_v29  ;;  %2784 = vmatpush3.bf16.msra.mxu1 %v3115_v38 }
 0x18d   : > { %2785 = vmatprep.subr.bf16.mxu1 %v3116_v39 }
 0x18f   : > { %1961 = vmatpush2.bf16.msra.mxu0 %v3105_v30 }
 0x190   : > { %2786 = vmatpush3.bf16.msra.mxu1 %v3117_v40 }
 0x191   : > { %2787 = vmatprep.subr.bf16.mxu1 %v3118_v41 }
 0x194   : > { %2788 = vmatpush3.bf16.msra.mxu1 %v3119_v42 }
 0x195   : > { %2789 = vmatprep.subr.bf16.mxu1 %v3120_v43 }
 0x212   : > { %v1454_v47 = vpop.f32.mrf.mxu0  ;;  %v1567_v48 = vpop.f32.mrf.mxu1 }
 0x213   : > { %v1455_v49 = vadd.f32 %v1454_v47, %v3797_v45 }
 0x214   : > { %v1456_v51 = vpop.f32.mrf.mxu0  ;;  %v1569_v52 = vpop.f32.mrf.mxu1 }
 0x215   : > { %v1457_v0 = vadd.f32 %v1456_v51, %v3800_v46  ;;  %v1568_v57 = vadd.f32 %v1567_v48, %v1455_v49 }
 0x216   : > { %v1458_v53 = vpop.f32.mrf.mxu0  ;;  %v1571_v54 = vpop.f32.mrf.mxu1 }
 0x217   : > { %v1570_v56 = vadd.f32 %v1569_v52, %v1457_v0  ;;  %v1459_v55 = vadd.f32 %v1458_v53, %v3797_v45  ;;  %v1646_v9 = vmul.f32 0.2, %v1568_v57 }
 0x218   : > { %v1460_v58 = vpop.f32.mrf.mxu0  ;;  %v1573_v59 = vpop.f32.mrf.mxu1 }
 0x219   : > { %v1572_v62 = vadd.f32 %v1571_v54, %v1459_v55  ;;  %v1461_v50 = vadd.f32 %v1460_v58, %v3800_v46  ;;  %v1647_v1 = vmul.f32 0.2, %v1570_v56  ;;  %v1678_v18 = vmax.f32 %v1568_v57, %v1646_v9 }
 0x21a   : > { %v1464_v63 = vpop.f32.mrf.mxu0  ;;  %v1577_v8 = vpop.f32.mrf.mxu1 }
 0x21b   : > { %v1648_v4 = vmul.f32 0.2, %v1572_v62  ;;  %v1574_v5 = vadd.f32 %v1573_v59, %v1461_v50  ;;  %v1465_v11 = vadd.f32 %v1464_v63, %v3797_v45  ;;  %v1679_v15 = vmax.f32 %v1570_v56, %v1647_v1 }
 0x21c   : > { %v1466_v10 = vpop.f32.mrf.mxu0  ;;  %v1579_v12 = vpop.f32.mrf.mxu1 }
 0x21d   : > { %v1649_v2 = vmul.f32 0.2, %v1574_v5  ;;  %v1467_v7 = vadd.f32 %v1466_v10, %v3800_v46  ;;  %v1680_v13 = vmax.f32 %v1572_v62, %v1648_v4  ;;  %v1578_v6 = vadd.f32 %v1577_v8, %v1465_v11 }
 0x21e   : > { %v1468_v14 = vpop.f32.mrf.mxu0  ;;  %v1581_v17 = vpop.f32.mrf.mxu1 }
 0x21f   : > { %v1681_v16 = vmax.f32 %v1574_v5, %v1649_v2  ;;  %v1580_v19 = vadd.f32 %v1579_v12, %v1467_v7  ;;  %v1469_v3 = vadd.f32 %v1468_v14, %v3797_v45  ;;  %v1710_v24 = vpack.c.bf16 %v1680_v13, %v1678_v18 }
 0x220   : > { %v1470_v20 = vpop.f32.mrf.mxu0  ;;  %v1583_v22 = vpop.f32.mrf.mxu1  ;;  %v1650_v32 = vmul.f32 0.2, %v1578_v6 }
 0x221   : > { %v1471_v21 = vadd.f32 %v1470_v20, %v3800_v46  ;;  %v1711_v23 = vpack.c.bf16 %v1681_v16, %v1679_v15  ;;  %v1582_v25 = vadd.f32 %v1581_v17, %v1469_v3  ;;  %v1651_v29 = vmul.f32 0.2, %v1580_v19 }
 0x222   : > { %v1474_v26 = vpop.f32.mrf.mxu0  ;;  %v1587_v28 = vpop.f32.mrf.mxu1  ;;  %v1682_v47 = vmax.f32 %v1578_v6, %v1650_v32 }
 0x223   : > { %v1584_v27 = vadd.f32 %v1583_v22, %v1471_v21  ;;  %1962 = vmatprep.mubr.bf16.mxu0 %v1711_v23  ;;  %v1652_v30 = vmul.f32 0.2, %v1582_v25  ;;  %v1475_v35 = vadd.f32 %v1474_v26, %v3797_v45  ;;  %v1683_v42 = vmax.f32 %v1580_v19, %v1651_v29 }
 0x224   : > { %v1476_v31 = vpop.f32.mrf.mxu0  ;;  %1963 = vmatmul.mubr.bf16.vlgmr.msra.gmra.mxu0 %v1710_v24  ;;  %v1589_v36 = vpop.f32.mrf.mxu1 }
 0x225   : > { %v1653_v33 = vmul.f32 0.2, %v1584_v27  ;;  %v1477_v34 = vadd.f32 %v1476_v31, %v3800_v46  ;;  %v1684_v38 = vmax.f32 %v1582_v25, %v1652_v30  ;;  %v1588_v48 = vadd.f32 %v1587_v28, %v1475_v35 }
 0x226   : > { %v1478_v37 = vpop.f32.mrf.mxu0  ;;  %v1591_v41 = vpop.f32.mrf.mxu1 }
 0x227   : > { %v1685_v39 = vmax.f32 %v1584_v27, %v1653_v33  ;;  %v1479_v40 = vadd.f32 %v1478_v37, %v3797_v45  ;;  %v1590_v43 = vadd.f32 %v1589_v36, %v1477_v34  ;;  %v1712_v57 = vpack.c.bf16 %v1684_v38, %v1682_v47 }
 0x228   : > { %v1480_v44 = vpop.f32.mrf.mxu0  ;;  %v1593_v52 = vpop.f32.mrf.mxu1  ;;  %v1654_v62 = vmul.f32 0.2, %v1588_v48 }
 0x229   : > { %v1592_v49 = vadd.f32 %v1591_v41, %v1479_v40  ;;  %v1481_v51 = vadd.f32 %v1480_v44, %v3800_v46  ;;  %v1713_v53 = vpack.c.bf16 %v1685_v39, %v1683_v42  ;;  %v1655_v58 = vmul.f32 0.2, %v1590_v43 }
 0x22a   : > { %v1484_v0 = vpop.f32.mrf.mxu0  ;;  %v1597_v55 = vpop.f32.mrf.mxu1  ;;  %v1686_v13 = vmax.f32 %v1588_v48, %v1654_v62 }
 0x22b   : > { %v1656_v54 = vmul.f32 0.2, %v1592_v49  ;;  %v1594_v56 = vadd.f32 %v1593_v52, %v1481_v51  ;;  %1972 = vmatprep.mubr.bf16.mxu0 %v1713_v53  ;;  %v1485_v63 = vadd.f32 %v1484_v0, %v3797_v45  ;;  %v1687_v11 = vmax.f32 %v1590_v43, %v1655_v58 }
 0x22c   : > { %v1486_v59 = vpop.f32.mrf.mxu0  ;;  %v1599_v4 = vpop.f32.mrf.mxu1  ;;  %1973 = vmatmul.mubr.bf16.gmra.mxu0 %v1712_v57 }
 0x22d   : > { %v1657_v50 = vmul.f32 0.2, %v1594_v56  ;;  %v1487_v1 = vadd.f32 %v1486_v59, %v3800_v46  ;;  %v1688_v8 = vmax.f32 %v1592_v49, %v1656_v54  ;;  %v1598_v14 = vadd.f32 %v1597_v55, %v1485_v63 }
 0x22e   : > { %v1488_v5 = vpop.f32.mrf.mxu0  ;;  %v1601_v2 = vpop.f32.mrf.mxu1 }
 0x22f   : > { %v1689_v9 = vmax.f32 %v1594_v56, %v1657_v50  ;;  %v1489_v10 = vadd.f32 %v1488_v5, %v3797_v45  ;;  %v1600_v7 = vadd.f32 %v1599_v4, %v1487_v1  ;;  %v1714_v21 = vpack.c.bf16 %v1688_v8, %v1686_v13 }
 0x230   : > { %v1490_v12 = vpop.f32.mrf.mxu0  ;;  %v1603_v17 = vpop.f32.mrf.mxu1  ;;  %v1658_v24 = vmul.f32 0.2, %v1598_v14 }
 0x231   : > { %v1602_v15 = vadd.f32 %v1601_v2, %v1489_v10  ;;  %v1491_v16 = vadd.f32 %v1490_v12, %v3800_v46  ;;  %v1715_v19 = vpack.c.bf16 %v1689_v9, %v1687_v11  ;;  %v1659_v22 = vmul.f32 0.2, %v1600_v7 }
 0x232   : > { %v1494_v18 = vpop.f32.mrf.mxu0  ;;  %v1607_v6 = vpop.f32.mrf.mxu1  ;;  %v1690_v37 = vmax.f32 %v1598_v14, %v1658_v24 }
 0x233   : > { %v1660_v3 = vmul.f32 0.2, %v1602_v15  ;;  %v1604_v20 = vadd.f32 %v1603_v17, %v1491_v16  ;;  %1982 = vmatprep.mubr.bf16.mxu0 %v1715_v19  ;;  %v1495_v26 = vadd.f32 %v1494_v18, %v3797_v45  ;;  %v1691_v35 = vmax.f32 %v1600_v7, %v1659_v22 }
 0x234   : > { %v1496_v23 = vpop.f32.mrf.mxu0  ;;  %v1609_v28 = vpop.f32.mrf.mxu1  ;;  %1983 = vmatmul.mubr.bf16.gmra.mxu0 %v1714_v21 }
 0x235   : > { %v1661_v25 = vmul.f32 0.2, %v1604_v20  ;;  %v1497_v27 = vadd.f32 %v1496_v23, %v3800_v46  ;;  %v1692_v30 = vmax.f32 %v1602_v15, %v1660_v3  ;;  %v1608_v38 = vadd.f32 %v1607_v6, %v1495_v26 }
 0x236   : > { %v1498_v29 = vpop.f32.mrf.mxu0  ;;  %v1611_v33 = vpop.f32.mrf.mxu1 }
 0x237   : > { %v1693_v31 = vmax.f32 %v1604_v20, %v1661_v25  ;;  %v1499_v32 = vadd.f32 %v1498_v29, %v3797_v45  ;;  %v1610_v34 = vadd.f32 %v1609_v28, %v1497_v27  ;;  %v1716_v49 = vpack.c.bf16 %v1692_v30, %v1690_v37 }
 0x238   : > { %v1500_v36 = vpop.f32.mrf.mxu0  ;;  %v1613_v41 = vpop.f32.mrf.mxu1  ;;  %v1662_v0 = vmul.f32 0.2, %v1608_v38 }
 0x239   : > { %v1612_v39 = vadd.f32 %v1611_v33, %v1499_v32  ;;  %v1501_v40 = vadd.f32 %v1500_v36, %v3800_v46  ;;  %v1717_v43 = vpack.c.bf16 %v1693_v31, %v1691_v35  ;;  %v1663_v51 = vmul.f32 0.2, %v1610_v34 }
 0x23a   : > { %v1504_v42 = vpop.f32.mrf.mxu0  ;;  %v1617_v48 = vpop.f32.mrf.mxu1  ;;  %v1694_v5 = vmax.f32 %v1608_v38, %v1662_v0 }
 0x23b   : > { %v1664_v44 = vmul.f32 0.2, %v1612_v39  ;;  %v1614_v47 = vadd.f32 %v1613_v41, %v1501_v40  ;;  %1992 = vmatprep.mubr.bf16.mxu0 %v1717_v43  ;;  %v1505_v54 = vadd.f32 %v1504_v42, %v3797_v45  ;;  %v1695_v63 = vmax.f32 %v1610_v34, %v1663_v51 }
 0x23c   : > { %v1506_v52 = vpop.f32.mrf.mxu0  ;;  %v1619_v55 = vpop.f32.mrf.mxu1  ;;  %1993 = vmatmul.mubr.bf16.gmra.mxu0 %v1716_v49 }
 0x23d   : > { %v1665_v53 = vmul.f32 0.2, %v1614_v47  ;;  %v1507_v56 = vadd.f32 %v1506_v52, %v3800_v46  ;;  %v1696_v58 = vmax.f32 %v1612_v39, %v1664_v44  ;;  %v1618_v8 = vadd.f32 %v1617_v48, %v1505_v54 }
 0x23e   : > { %v1508_v57 = vpop.f32.mrf.mxu0  ;;  %v1621_v50 = vpop.f32.mrf.mxu1 }
 0x23f   : > { %v1697_v59 = vmax.f32 %v1614_v47, %v1665_v53  ;;  %v1509_v62 = vadd.f32 %v1508_v57, %v3797_v45  ;;  %v1620_v1 = vadd.f32 %v1619_v55, %v1507_v56  ;;  %v1718_v15 = vpack.c.bf16 %v1696_v58, %v1694_v5 }
 0x240   : > { %v1510_v4 = vpop.f32.mrf.mxu0  ;;  %v1623_v2 = vpop.f32.mrf.mxu1  ;;  %v1666_v18 = vmul.f32 0.2, %v1618_v8 }
 0x241   : > { %v1622_v9 = vadd.f32 %v1621_v50, %v1509_v62  ;;  %v1511_v10 = vadd.f32 %v1510_v4, %v3800_v46  ;;  %v1719_v7 = vpack.c.bf16 %v1697_v59, %v1695_v63  ;;  %v1667_v16 = vmul.f32 0.2, %v1620_v1 }
 0x242   : > { %v1514_v11 = vpop.f32.mrf.mxu0  ;;  %v1698_v29 = vmax.f32 %v1618_v8, %v1666_v18 }
 0x243   : > { %v1668_v12 = vmul.f32 0.2, %v1622_v9  ;;  %v1624_v13 = vadd.f32 %v1623_v2, %v1511_v10  ;;  %v1627_v14 = vpop.f32.mrf.mxu1  ;;  %2002 = vmatprep.mubr.bf16.mxu0 %v1719_v7  ;;  %v1515_v3 = vadd.f32 %v1514_v11, %v3797_v45  ;;  %v1699_v26 = vmax.f32 %v1620_v1, %v1667_v16  ;;  %v1758_v16 = vld [vmem:[%s4039_s6] sm:$0x3] }
 0x244   : > { %v1516_v17 = vpop.f32.mrf.mxu0  ;;  %2003 = vmatmul.mubr.bf16.gmra.mxu0 %v1718_v15  ;;  %v3123_v15 = vld [vmem:[%s4040_s7] sm:$0xff]   ;;  %v3850_v18 = vrot.slane %v1758_v16, %v3574_v60 }
 0x245   : > { %v1669_v19 = vmul.f32 0.2, %v1624_v13  ;;  %v1517_v20 = vadd.f32 %v1516_v17, %v3800_v46  ;;  %v1629_v6 = vpop.f32.mrf.mxu1  ;;  %v1700_v22 = vmax.f32 %v1622_v9, %v1668_v12  ;;  %v1628_v30 = vadd.f32 %v1627_v14, %v1515_v3  ;;  %v3122_v14 = vld [vmem:[%s4040_s7 + $0x40] sm:$0xff]  }
 0x246   : > { %v1518_v21 = vpop.f32.mrf.mxu0  ;;  %v3847_v17 = vrot.slane %v1758_v16, %v3576_v61 }
 0x247   : > { %v1701_v23 = vmax.f32 %v1624_v13, %v1669_v19  ;;  %v1519_v24 = vadd.f32 %v1518_v21, %v3797_v45  ;;  %v1631_v25 = vpop.f32.mrf.mxu1  ;;  %v1630_v27 = vadd.f32 %v1629_v6, %v1517_v20  ;;  %v1720_v39 = vpack.c.bf16 %v1700_v22, %v1698_v29 }
 0x248   : > { %v1520_v28 = vpop.f32.mrf.mxu0  ;;  %v1670_v42 = vmul.f32 0.2, %v1628_v30 }
 0x249   : > { %v1632_v31 = vadd.f32 %v1631_v25, %v1519_v24  ;;  %v1521_v32 = vadd.f32 %v1520_v28, %v3800_v46  ;;  %v1633_v33 = vpop.f32.mrf.mxu1  ;;  %v1721_v34 = vpack.c.bf16 %v1701_v23, %v1699_v26  ;;  %v1671_v40 = vmul.f32 0.2, %v1630_v27 }
 0x24a   : > { %v1524_v35 = vpop.f32.mrf.mxu0  ;;  %v1702_v57 = vmax.f32 %v1628_v30, %v1670_v42 }
 0x24b   : > { %v1672_v36 = vmul.f32 0.2, %v1632_v31  ;;  %v1634_v37 = vadd.f32 %v1633_v33, %v1521_v32  ;;  %v1637_v38 = vpop.f32.mrf.mxu1  ;;  %2012 = vmatprep.mubr.bf16.mxu0 %v1721_v34  ;;  %v1525_v44 = vadd.f32 %v1524_v35, %v3797_v45  ;;  %v1703_v56 = vmax.f32 %v1630_v27, %v1671_v40 }
 0x24c   : > { %v1526_v41 = vpop.f32.mrf.mxu0  ;;  %2013 = vmatmul.mubr.bf16.gmra.mxu0 %v1720_v39 }
 0x24d   : > { %v1673_v43 = vmul.f32 0.2, %v1634_v37  ;;  %v1527_v47 = vadd.f32 %v1526_v41, %v3800_v46  ;;  %v1639_v48 = vpop.f32.mrf.mxu1  ;;  %v1704_v51 = vmax.f32 %v1632_v31, %v1672_v36  ;;  %v1638_v58 = vadd.f32 %v1637_v38, %v1525_v44 }
 0x24e   : > { %v1528_v49 = vpop.f32.mrf.mxu0 }
 0x24f   : > { %v1705_v52 = vmax.f32 %v1634_v37, %v1673_v43  ;;  %v1640_v0 = vadd.f32 %v1639_v48, %v1527_v47  ;;  %v1529_v53 = vadd.f32 %v1528_v49, %v3797_v45  ;;  %v1641_v54 = vpop.f32.mrf.mxu1  ;;  %v1722_v8 = vpack.c.bf16 %v1704_v51, %v1702_v57 }
 0x250   : > { %v1530_v55 = vpop.f32.mrf.mxu0  ;;  %v1674_v9 = vmul.f32 0.2, %v1638_v58 }
 0x251   : > { %v1642_v59 = vadd.f32 %v1641_v54, %v1529_v53  ;;  %v1531_v62 = vadd.f32 %v1530_v55, %v3800_v46  ;;  %v1643_v50 = vpop.f32.mrf.mxu1  ;;  %v1723_v63 = vpack.c.bf16 %v1705_v52, %v1703_v56  ;;  %v1675_v1 = vmul.f32 0.2, %v1640_v0  ;;  %v3121_v46 = vld [vmem:[%s4040_s7 + $0x8] sm:$0xff]  }
 0x252   : > { %v1706_v7 = vmax.f32 %v1638_v58, %v1674_v9  ;;  %2790 = vmatpush3.bf16.msra.mxu1 %v3121_v46 }
 0x253   : > { %v1676_v4 = vmul.f32 0.2, %v1642_v59  ;;  %v1644_v5 = vadd.f32 %v1643_v50, %v1531_v62  ;;  %2022 = vmatprep.mubr.bf16.mxu0 %v1723_v63  ;;  %v1707_v2 = vmax.f32 %v1640_v0, %v1675_v1  ;;  %2791 = vmatprep.subr.bf16.mxu1 %v3122_v14 }
 0x254   : > { %2023 = vmatmul.mubr.bf16.gmra.mxu0 %v1722_v8 }
 0x255   : > { %v1677_v10 = vmul.f32 0.2, %v1644_v5  ;;  %v1708_v45 = vmax.f32 %v1642_v59, %v1676_v4 }
 0x256   : > { %2792 = vmatpush3.bf16.msra.mxu1 %v3123_v15 }
 0x257   : > { %v1709_v11 = vmax.f32 %v1644_v5, %v1677_v10  ;;  %v1724_v13 = vpack.c.bf16 %v1708_v45, %v1706_v7 }
 0x259   : > { %v1725_v12 = vpack.c.bf16 %v1709_v11, %v1707_v2 }
 0x25b   : > { %2032 = vmatprep.mubr.bf16.mxu0 %v1725_v12 }
 0x25c   : > { %2033 = vmatmul.mubr.bf16.gmra.mxu0 %v1724_v13 }
 0x2e4   : > { %v1964_v19 = vpop.f32.mrf.mxu0 }
 0x2e5   : > { %v1965_v6 = vadd.f32 %v1964_v19, %v3850_v18 }
 0x2e6   : > { %v1966_v3 = vpop.f32.mrf.mxu0 }
 0x2e7   : > { %v1967_v20 = vadd.f32 %v1966_v3, %v3847_v17  ;;  %v2043_v27 = vmul.f32 0.2, %v1965_v6 }
 0x2e8   : > { %v1968_v21 = vpop.f32.mrf.mxu0 }
 0x2e9   : > { %v1969_v22 = vadd.f32 %v1968_v21, %v3850_v18  ;;  %v2044_v24 = vmul.f32 0.2, %v1967_v20  ;;  %v2075_v32 = vmax.f32 %v1965_v6, %v2043_v27 }
 0x2ea   : > { %v1970_v23 = vpop.f32.mrf.mxu0 }
 0x2eb   : > { %v2045_v25 = vmul.f32 0.2, %v1969_v22  ;;  %v1971_v26 = vadd.f32 %v1970_v23, %v3847_v17  ;;  %v2076_v60 = vmax.f32 %v1967_v20, %v2044_v24 }
 0x2ec   : > { %v1974_v28 = vpop.f32.mrf.mxu0 }
 0x2ed   : > { %v2046_v61 = vmul.f32 0.2, %v1971_v26  ;;  %v2077_v29 = vmax.f32 %v1969_v22, %v2045_v25  ;;  %v1975_v35 = vadd.f32 %v1974_v28, %v3850_v18 }
 0x2ee   : > { %v1976_v31 = vpop.f32.mrf.mxu0 }
 0x2ef   : > { %v2078_v30 = vmax.f32 %v1971_v26, %v2046_v61  ;;  %v1977_v33 = vadd.f32 %v1976_v31, %v3847_v17  ;;  %v2107_v37 = vpack.c.bf16 %v2077_v29, %v2075_v32  ;;  %v2047_v43 = vmul.f32 0.2, %v1975_v35 }
 0x2f0   : > { %v1978_v34 = vpop.f32.mrf.mxu0 }
 0x2f1   : > { %v2108_v36 = vpack.c.bf16 %v2078_v30, %v2076_v60  ;;  %v1979_v38 = vadd.f32 %v1978_v34, %v3850_v18  ;;  %v2048_v40 = vmul.f32 0.2, %v1977_v33  ;;  %v2079_v53 = vmax.f32 %v1975_v35, %v2047_v43 }
 0x2f2   : > { %v1980_v39 = vpop.f32.mrf.mxu0 }
 0x2f3   : > { %2290 = vmatprep.mubr.bf16.mxu1 %v2108_v36  ;;  %v2049_v41 = vmul.f32 0.2, %v1979_v38  ;;  %v1981_v42 = vadd.f32 %v1980_v39, %v3847_v17  ;;  %v2080_v51 = vmax.f32 %v1977_v33, %v2048_v40 }
 0x2f4   : > { %2291 = vmatmul.mubr.bf16.vlgmr.msra.gmra.mxu1 %v2107_v37  ;;  %v1984_v44 = vpop.f32.mrf.mxu0 }
 0x2f5   : > { %v2050_v47 = vmul.f32 0.2, %v1981_v42  ;;  %v2081_v48 = vmax.f32 %v1979_v38, %v2049_v41  ;;  %v1985_v54 = vadd.f32 %v1984_v44, %v3850_v18 }
 0x2f6   : > { %v1986_v49 = vpop.f32.mrf.mxu0 }
 0x2f7   : > { %v2082_v52 = vmax.f32 %v1981_v42, %v2050_v47  ;;  %v1987_v0 = vadd.f32 %v1986_v49, %v3847_v17  ;;  %v2109_v59 = vpack.c.bf16 %v2081_v48, %v2079_v53  ;;  %v2051_v1 = vmul.f32 0.2, %v1985_v54 }
 0x2f8   : > { %v1988_v56 = vpop.f32.mrf.mxu0 }
 0x2f9   : > { %v1989_v55 = vadd.f32 %v1988_v56, %v3850_v18  ;;  %v2110_v57 = vpack.c.bf16 %v2082_v52, %v2080_v51  ;;  %v2052_v62 = vmul.f32 0.2, %v1987_v0  ;;  %v2083_v11 = vmax.f32 %v1985_v54, %v2051_v1 }
 0x2fa   : > { %v1990_v58 = vpop.f32.mrf.mxu0 }
 0x2fb   : > { %v2053_v50 = vmul.f32 0.2, %v1989_v55  ;;  %v1991_v63 = vadd.f32 %v1990_v58, %v3847_v17  ;;  %2298 = vmatprep.mubr.bf16.mxu1 %v2110_v57  ;;  %v2084_v10 = vmax.f32 %v1987_v0, %v2052_v62 }
 0x2fc   : > { %v1994_v4 = vpop.f32.mrf.mxu0  ;;  %2299 = vmatmul.mubr.bf16.gmra.mxu1 %v2109_v59 }
 0x2fd   : > { %v2054_v5 = vmul.f32 0.2, %v1991_v63  ;;  %v2085_v8 = vmax.f32 %v1989_v55, %v2053_v50  ;;  %v1995_v7 = vadd.f32 %v1994_v4, %v3850_v18 }
 0x2fe   : > { %v1996_v9 = vpop.f32.mrf.mxu0 }
 0x2ff   : > { %v2086_v2 = vmax.f32 %v1991_v63, %v2054_v5  ;;  %v1997_v45 = vadd.f32 %v1996_v9, %v3847_v17  ;;  %v2111_v15 = vpack.c.bf16 %v2085_v8, %v2083_v11  ;;  %v2055_v20 = vmul.f32 0.2, %v1995_v7 }
 0x300   : > { %v1998_v12 = vpop.f32.mrf.mxu0 }
 0x301   : > { %v1999_v13 = vadd.f32 %v1998_v12, %v3850_v18  ;;  %v2112_v46 = vpack.c.bf16 %v2086_v2, %v2084_v10  ;;  %v2056_v16 = vmul.f32 0.2, %v1997_v45  ;;  %v2087_v27 = vmax.f32 %v1995_v7, %v2055_v20 }
 0x302   : > { %v2000_v14 = vpop.f32.mrf.mxu0 }
 0x303   : > { %v2057_v19 = vmul.f32 0.2, %v1999_v13  ;;  %v2001_v3 = vadd.f32 %v2000_v14, %v3847_v17  ;;  %2306 = vmatprep.mubr.bf16.mxu1 %v2112_v46  ;;  %v2088_v24 = vmax.f32 %v1997_v45, %v2056_v16 }
 0x304   : > { %v2004_v6 = vpop.f32.mrf.mxu0  ;;  %2307 = vmatmul.mubr.bf16.gmra.mxu1 %v2111_v15 }
 0x305   : > { %v2058_v21 = vmul.f32 0.2, %v2001_v3  ;;  %v2089_v22 = vmax.f32 %v1999_v13, %v2057_v19  ;;  %v2005_v61 = vadd.f32 %v2004_v6, %v3850_v18 }
 0x306   : > { %v2006_v23 = vpop.f32.mrf.mxu0 }
 0x307   : > { %v2090_v25 = vmax.f32 %v2001_v3, %v2058_v21  ;;  %v2007_v26 = vadd.f32 %v2006_v23, %v3847_v17  ;;  %v2113_v31 = vpack.c.bf16 %v2089_v22, %v2087_v27  ;;  %v2059_v34 = vmul.f32 0.2, %v2005_v61 }
 0x308   : > { %v2008_v28 = vpop.f32.mrf.mxu0 }
 0x309   : > { %v2009_v29 = vadd.f32 %v2008_v28, %v3850_v18  ;;  %v2114_v60 = vpack.c.bf16 %v2090_v25, %v2088_v24  ;;  %v2060_v32 = vmul.f32 0.2, %v2007_v26  ;;  %v2091_v43 = vmax.f32 %v2005_v61, %v2059_v34  ;;  %v3887_v34 = vld [vmem:[%s4041_s8] ss:$0 sm:$0xff] }
 0x30a   : > { %v2010_v30 = vpop.f32.mrf.mxu0 }
 0x30b   : > { %v2061_v33 = vmul.f32 0.2, %v2009_v29  ;;  %v2011_v35 = vadd.f32 %v2010_v30, %v3847_v17  ;;  %2314 = vmatprep.mubr.bf16.mxu1 %v2114_v60  ;;  %v2092_v40 = vmax.f32 %v2007_v26, %v2060_v32 }
 0x30c   : > { %v2014_v36 = vpop.f32.mrf.mxu0  ;;  %2315 = vmatmul.mubr.bf16.gmra.mxu1 %v2113_v31 }
 0x30d   : > { %v2062_v37 = vmul.f32 0.2, %v2011_v35  ;;  %v2093_v38 = vmax.f32 %v2009_v29, %v2061_v33  ;;  %v2015_v44 = vadd.f32 %v2014_v36, %v3850_v18 }
 0x30e   : > { %v2016_v39 = vpop.f32.mrf.mxu0 }
 0x30f   : > { %v2094_v41 = vmax.f32 %v2011_v35, %v2062_v37  ;;  %v2017_v42 = vadd.f32 %v2016_v39, %v3847_v17  ;;  %v2115_v52 = vpack.c.bf16 %v2093_v38, %v2091_v43  ;;  %v2063_v56 = vmul.f32 0.2, %v2015_v44 }
 0x310   : > { %v2018_v47 = vpop.f32.mrf.mxu0 }
 0x311   : > { %v2019_v48 = vadd.f32 %v2018_v47, %v3850_v18  ;;  %v2116_v49 = vpack.c.bf16 %v2094_v41, %v2092_v40  ;;  %v2064_v0 = vmul.f32 0.2, %v2017_v42  ;;  %v2095_v1 = vmax.f32 %v2015_v44, %v2063_v56 }
 0x312   : > { %v2020_v51 = vpop.f32.mrf.mxu0 }
 0x313   : > { %v2065_v53 = vmul.f32 0.2, %v2019_v48  ;;  %v2021_v54 = vadd.f32 %v2020_v51, %v3847_v17  ;;  %2322 = vmatprep.mubr.bf16.mxu1 %v2116_v49  ;;  %v2096_v62 = vmax.f32 %v2017_v42, %v2064_v0 }
 0x314   : > { %v2024_v55 = vpop.f32.mrf.mxu0  ;;  %2323 = vmatmul.mubr.bf16.gmra.mxu1 %v2115_v52 }
 0x315   : > { %v2066_v57 = vmul.f32 0.2, %v2021_v54  ;;  %v2097_v58 = vmax.f32 %v2019_v48, %v2065_v53  ;;  %v2025_v4 = vadd.f32 %v2024_v55, %v3850_v18 }
 0x316   : > { %v2026_v59 = vpop.f32.mrf.mxu0 }
 0x317   : > { %v2098_v50 = vmax.f32 %v2021_v54, %v2066_v57  ;;  %v2027_v63 = vadd.f32 %v2026_v59, %v3847_v17  ;;  %v2117_v2 = vpack.c.bf16 %v2097_v58, %v2095_v1  ;;  %v2067_v12 = vmul.f32 0.2, %v2025_v4 }
 0x318   : > { %v2028_v5 = vpop.f32.mrf.mxu0 }
 0x319   : > { %v2029_v8 = vadd.f32 %v2028_v5, %v3850_v18  ;;  %v2118_v9 = vpack.c.bf16 %v2098_v50, %v2096_v62  ;;  %v2068_v45 = vmul.f32 0.2, %v2027_v63  ;;  %v2099_v20 = vmax.f32 %v2025_v4, %v2067_v12 }
 0x31a   : > { %v2030_v10 = vpop.f32.mrf.mxu0 }
 0x31b   : > { %v2069_v11 = vmul.f32 0.2, %v2029_v8  ;;  %v2031_v7 = vadd.f32 %v2030_v10, %v3847_v17  ;;  %2330 = vmatprep.mubr.bf16.mxu1 %v2118_v9  ;;  %v2100_v16 = vmax.f32 %v2027_v63, %v2068_v45 }
 0x31c   : > { %v2034_v13 = vpop.f32.mrf.mxu0  ;;  %2331 = vmatmul.mubr.bf16.gmra.mxu1 %v2117_v2 }
 0x31d   : > { %v2070_v46 = vmul.f32 0.2, %v2031_v7  ;;  %v2101_v14 = vmax.f32 %v2029_v8, %v2069_v11  ;;  %v2035_v6 = vadd.f32 %v2034_v13, %v3850_v18 }
 0x31e   : > { %v2036_v15 = vpop.f32.mrf.mxu0 }
 0x31f   : > { %v2102_v19 = vmax.f32 %v2031_v7, %v2070_v46  ;;  %v2037_v3 = vadd.f32 %v2036_v15, %v3847_v17  ;;  %v2119_v25 = vpack.c.bf16 %v2101_v14, %v2099_v20  ;;  %v2071_v28 = vmul.f32 0.2, %v2035_v6 }
 0x320   : > { %v2038_v21 = vpop.f32.mrf.mxu0 }
 0x321   : > { %v2039_v22 = vadd.f32 %v2038_v21, %v3850_v18  ;;  %v2120_v23 = vpack.c.bf16 %v2102_v19, %v2100_v16  ;;  %v2072_v26 = vmul.f32 0.2, %v2037_v3  ;;  %v2103_v32 = vmax.f32 %v2035_v6, %v2071_v28 }
 0x322   : > { %v2040_v24 = vpop.f32.mrf.mxu0 }
 0x323   : > { %v2073_v27 = vmul.f32 0.2, %v2039_v22  ;;  %v2041_v61 = vadd.f32 %v2040_v24, %v3847_v17  ;;  %2338 = vmatprep.mubr.bf16.mxu1 %v2120_v23  ;;  %v2104_v30 = vmax.f32 %v2037_v3, %v2072_v26 }
 0x324   : > { %2339 = vmatmul.mubr.bf16.gmra.mxu1 %v2119_v25 }
 0x325   : > { %v2074_v29 = vmul.f32 0.2, %v2041_v61  ;;  %v2105_v60 = vmax.f32 %v2039_v22, %v2073_v27 }
 0x327   : > { %v2106_v31 = vmax.f32 %v2041_v61, %v2074_v29  ;;  %v2121_v35 = vpack.c.bf16 %v2105_v60, %v2103_v32 }
 0x329   : > { %v2122_v33 = vpack.c.bf16 %v2106_v31, %v2104_v30 }
 0x32b   : > { %2346 = vmatprep.mubr.bf16.mxu1 %v2122_v33 }
 0x32c   : > { %2347 = vmatmul.mubr.bf16.gmra.mxu1 %v2121_v35 }
 0x3b4   : > { %v2793_v18 = vpop.f32.mrf.mxu1 }
 0x3b6   : > { %v2794_v36 = vpop.f32.mrf.mxu1 }
 0x3b7   : > { %v2795_v17 = vadd.f32 %v2794_v36, %v2793_v18 }
 0x3b8   : > { %v2796_v37 = vpop.f32.mrf.mxu1 }
 0x3b9   : > { %v3890_v38 = vadd.f32 %v2795_v17, %v3887_v34 }
 0x3ba   : > { %v2797_v39 = vpop.f32.mrf.mxu1 }
 0x3bb   : > { %v2355_v40 = vand.u32 2147483647, %v3890_v38  ;;  %v2798_v41 = vadd.f32 %v2797_v39, %v2796_v37  ;;  %vm2451_vm0 = vcmp.ge.f32.partialorder %v3890_v38, 0.0 }
 0x3bc   : > { %v2799_v44 = vpop.f32.mrf.mxu1 }
 0x3bd   : > { %v2371_v42 = vsub.f32 0.0, %v2355_v40  ;;  %v3894_v43 = vadd.f32 %v2798_v41, %v3887_v34 }
 0x3be   : > { %v2800_v49 = vpop.f32.mrf.mxu1 }
 0x3bf   : > { %v2387_v47 = vmul.f32 1.442695, %v2371_v42  ;;  %v2356_v48 = vand.u32 2147483647, %v3894_v43  ;;  %v2801_v51 = vadd.f32 %v2800_v49, %v2799_v44  ;;  %vm2452_vm2 = vcmp.ge.f32.partialorder %v3894_v43, 0.0 }
 0x3c0   : > { %v2802_v0 = vpop.f32.mrf.mxu1 }
 0x3c1   : > { %3124 = vpow2.f32 %v2387_v47  ;;  %v2372_v52 = vsub.f32 0.0, %v2356_v48  ;;  %v3898_v53 = vadd.f32 %v2801_v51, %v3887_v34 }
 0x3c2   : > { %v2803_v56 = vpop.f32.mrf.mxu1 }
 0x3c3   : > { %v2389_v54 = vmul.f32 1.442695, %v2372_v52  ;;  %v2357_v55 = vand.u32 2147483647, %v3898_v53  ;;  %v2804_v57 = vadd.f32 %v2803_v56, %v2802_v0  ;;  %vm2453_vm3 = vcmp.ge.f32.partialorder %v3898_v53, 0.0 }
 0x3c4   : > { %v2805_v58 = vpop.f32.mrf.mxu1 }
 0x3c5   : > { %3126 = vpow2.f32 %v2389_v54  ;;  %v2373_v59 = vsub.f32 0.0, %v2357_v55  ;;  %v3902_v62 = vadd.f32 %v2804_v57, %v3887_v34 }
 0x3c6   : > { %v2806_v50 = vpop.f32.mrf.mxu1 }
 0x3c7   : > { %v2391_v63 = vmul.f32 1.442695, %v2373_v59  ;;  %v2358_v1 = vand.u32 2147483647, %v3902_v62  ;;  %v2807_v4 = vadd.f32 %v2806_v50, %v2805_v58  ;;  %vm2454_vm4 = vcmp.ge.f32.partialorder %v3902_v62, 0.0 }
 0x3c8   : > { %v2808_v5 = vpop.f32.mrf.mxu1 }
 0x3c9   : > { %3128 = vpow2.f32 %v2391_v63  ;;  %v2374_v8 = vsub.f32 0.0, %v2358_v1  ;;  %v3906_v9 = vadd.f32 %v2807_v4, %v3887_v34 }
 0x3ca   : > { %v2809_v10 = vpop.f32.mrf.mxu1 }
 0x3cb   : > { %v2393_v2 = vmul.f32 1.442695, %v2374_v8  ;;  %v2359_v45 = vand.u32 2147483647, %v3906_v9  ;;  %v2810_v11 = vadd.f32 %v2809_v10, %v2808_v5  ;;  %vm2455_vm5 = vcmp.ge.f32.partialorder %v3906_v9, 0.0 }
 0x3cc   : > { %v2811_v7 = vpop.f32.mrf.mxu1 }
 0x3cd   : > { %3130 = vpow2.f32 %v2393_v2  ;;  %v2375_v13 = vsub.f32 0.0, %v2359_v45  ;;  %v3910_v46 = vadd.f32 %v2810_v11, %v3887_v34 }
 0x3ce   : > { %v3125_v12 = vpop.eup %3124  ;;  %v2812_v15 = vpop.f32.mrf.mxu1 }
 0x3cf   : > { %v2419_v14 = vadd.f32 1.0, %v3125_v12  ;;  %v2395_v16 = vmul.f32 1.442695, %v2375_v13  ;;  %v2360_v19 = vand.u32 2147483647, %v3910_v46  ;;  %v2813_v3 = vadd.f32 %v2812_v15, %v2811_v7 }
 0x3d0   : > { %v2814_v20 = vpop.f32.mrf.mxu1  ;;  %v2467_v49 = vsel %vm2451_vm0, 1.0, %v3125_v12  ;;  %vm2456_vm6 = vcmp.ge.f32.partialorder %v3910_v46, 0.0 }
 0x3d1   : > { %3132 = vrcp.f32 %v2419_v14  ;;  %v2376_v21 = vsub.f32 0.0, %v2360_v19  ;;  %v3916_v22 = vadd.f32 %v2813_v3, %v3887_v34 }
 0x3d2   : > { %v3127_v6 = vpop.eup %3126  ;;  %3134 = vpow2.f32 %v2395_v16  ;;  %v2815_v24 = vpop.f32.mrf.mxu1 }
 0x3d3   : > { %v2420_v23 = vadd.f32 1.0, %v3127_v6  ;;  %v2397_v25 = vmul.f32 1.442695, %v2376_v21  ;;  %v2361_v26 = vand.u32 2147483647, %v3916_v22  ;;  %v2816_v27 = vadd.f32 %v2815_v24, %v2814_v20 }
 0x3d4   : > { %v2817_v61 = vpop.f32.mrf.mxu1  ;;  %v2468_v63 = vsel %vm2452_vm2, 1.0, %v3127_v6  ;;  %vm2457_vm7 = vcmp.ge.f32.partialorder %v3916_v22, 0.0 }
 0x3d5   : > { %3136 = vrcp.f32 %v2420_v23  ;;  %v2377_v28 = vsub.f32 0.0, %v2361_v26  ;;  %v3920_v29 = vadd.f32 %v2816_v27, %v3887_v34 }
 0x3d6   : > { %3138 = vpow2.f32 %v2397_v25  ;;  %v3129_v60 = vpop.eup %3128  ;;  %v2818_v30 = vpop.f32.mrf.mxu1 }
 0x3d7   : > { %v2421_v31 = vadd.f32 1.0, %v3129_v60  ;;  %v2399_v32 = vmul.f32 1.442695, %v2377_v28  ;;  %v2362_v33 = vand.u32 2147483647, %v3920_v29  ;;  %v2819_v35 = vadd.f32 %v2818_v30, %v2817_v61 }
 0x3d8   : > { %v2820_v18 = vpop.f32.mrf.mxu1  ;;  %v2469_v14 = vsel %vm2453_vm3, 1.0, %v3129_v60  ;;  %vm2458_vm8 = vcmp.ge.f32.partialorder %v3920_v29, 0.0 }
 0x3d9   : > { %3140 = vrcp.f32 %v2421_v31  ;;  %v2378_v36 = vsub.f32 0.0, %v2362_v33  ;;  %v3926_v37 = vadd.f32 %v2819_v35, %v3887_v34 }
 0x3da   : > { %v3923_v17 = vpop.eup %3130  ;;  %3142 = vpow2.f32 %v2399_v32  ;;  %v2821_v39 = vpop.f32.mrf.mxu1 }
 0x3db   : > { %v2422_v40 = vadd.f32 1.0, %v3923_v17  ;;  %v2401_v41 = vmul.f32 1.442695, %v2378_v36  ;;  %v2822_v42 = vadd.f32 %v2821_v39, %v2820_v18  ;;  %v2363_v44 = vand.u32 2147483647, %v3926_v37 }
 0x3dc   : > { %v2823_v47 = vpop.f32.mrf.mxu1  ;;  %v2470_v27 = vsel %vm2454_vm4, 1.0, %v3923_v17  ;;  %vm2459_vm9 = vcmp.ge.f32.partialorder %v3926_v37, 0.0 }
 0x3dd   : > { %3144 = vrcp.f32 %v2422_v40  ;;  %v3937_v51 = vadd.f32 %v2822_v42, %v3887_v34  ;;  %v2379_v38 = vsub.f32 0.0, %v2363_v44 }
 0x3de   : > { %v3133_v48 = vpop.eup %3132  ;;  %3146 = vpow2.f32 %v2401_v41  ;;  %v2824_v54 = vpop.f32.mrf.mxu1 }
 0x3df   : > { %v3939_v52 = vpop.eup %3134  ;;  %v2483_v0 = vmul.f32 %v3133_v48, %v2467_v49  ;;  %v2364_v55 = vand.u32 2147483647, %v3937_v51  ;;  %v2403_v57 = vmul.f32 1.442695, %v2379_v38  ;;  %v2825_v58 = vadd.f32 %v2824_v54, %v2823_v47 }
 0x3e0   : > { %v2423_v56 = vadd.f32 1.0, %v3939_v52  ;;  %v2826_v59 = vpop.f32.mrf.mxu1  ;;  %v2471_v36 = vsel %vm2455_vm5, 1.0, %v3939_v52  ;;  %vm2460_vm10 = vcmp.ge.f32.partialorder %v3937_v51, 0.0 }
 0x3e1   : > { %2500 = vst.msk [vmem:[%s3934_s28] sm:$0xff] %vm2499_vm1, %v2483_v0  ;;  %v2380_v1 = vsub.f32 0.0, %v2364_v55  ;;  %v3949_v8 = vadd.f32 %v2825_v58, %v3887_v34 }
 0x3e2   : > { %v3137_v50 = vpop.eup %3136  ;;  %3148 = vrcp.f32 %v2423_v56  ;;  %v2827_v10 = vpop.f32.mrf.mxu1 }
 0x3e3   : > { %v3946_v4 = vpop.eup %3138  ;;  %v2484_v5 = vmul.f32 %v3137_v50, %v2468_v63  ;;  %3150 = vpow2.f32 %v2403_v57  ;;  %v2405_v45 = vmul.f32 1.442695, %v2380_v1  ;;  %v2828_v43 = vadd.f32 %v2827_v10, %v2826_v59 }
 0x3e4   : > { %v2424_v2 = vadd.f32 1.0, %v3946_v4  ;;  %v2365_v11 = vand.u32 2147483647, %v3949_v8  ;;  %v2829_v7 = vpop.f32.mrf.mxu1  ;;  %v2472_v0 = vsel %vm2456_vm6, 1.0, %v3946_v4  ;;  %vm2461_vm11 = vcmp.ge.f32.partialorder %v3949_v8, 0.0 }
 0x3e5   : > { %2501 = vst.msk [vmem:[%s3934_s28 + $0x8] sm:$0xff] %vm2499_vm1, %v2484_v5  ;;  %v3957_v12 = vadd.f32 %v2828_v43, %v3887_v34 }
 0x3e6   : > { %3152 = vrcp.f32 %v2424_v2  ;;  %v3141_v13 = vpop.eup %3140  ;;  %v2381_v15 = vsub.f32 0.0, %v2365_v11  ;;  %v2830_v16 = vpop.f32.mrf.mxu1 }
 0x3e7   : > { %3154 = vpow2.f32 %v2405_v45  ;;  %v3143_v19 = vpop.eup %3142  ;;  %v2485_v3 = vmul.f32 %v3141_v13, %v2469_v14  ;;  %v2366_v20 = vand.u32 2147483647, %v3957_v12  ;;  %v2831_v6 = vadd.f32 %v2830_v16, %v2829_v7 }
 0x3e8   : > { %v2425_v21 = vadd.f32 1.0, %v3143_v19  ;;  %v2407_v23 = vmul.f32 1.442695, %v2381_v15  ;;  %v2832_v24 = vpop.f32.mrf.mxu1  ;;  %v2473_v4 = vsel %vm2457_vm7, 1.0, %v3143_v19  ;;  %vm2462_vm12 = vcmp.ge.f32.partialorder %v3957_v12, 0.0 }
 0x3e9   : > { %2502 = vst.msk [vmem:[%s3934_s28 + $0x10] sm:$0xff] %vm2499_vm1, %v2485_v3  ;;  %v2382_v53 = vsub.f32 0.0, %v2366_v20  ;;  %v3964_v25 = vadd.f32 %v2831_v6, %v3887_v34 }
 0x3ea   : > { %v3145_v26 = vpop.eup %3144  ;;  %3156 = vrcp.f32 %v2425_v21  ;;  %v2833_v61 = vpop.f32.mrf.mxu1 }
 0x3eb   : > { %v3147_v28 = vpop.eup %3146  ;;  %v2486_v60 = vmul.f32 %v3145_v26, %v2470_v27  ;;  %3158 = vpow2.f32 %v2407_v23  ;;  %v2409_v30 = vmul.f32 1.442695, %v2382_v53  ;;  %v2367_v31 = vand.u32 2147483647, %v3964_v25 }
 0x3ec   : > { %v2426_v32 = vadd.f32 1.0, %v3147_v28  ;;  %v2834_v33 = vadd.f32 %v2833_v61, %v2832_v24  ;;  %v2835_v35 = vpop.f32.mrf.mxu1  ;;  %v2474_v22 = vsel %vm2458_vm8, 1.0, %v3147_v28  ;;  %vm2463_vm13 = vcmp.ge.f32.partialorder %v3964_v25, 0.0 }
 0x3ed   : > { %2503 = vst.msk [vmem:[%s3934_s28 + $0x18] sm:$0xff] %vm2499_vm1, %v2486_v60  ;;  %3160 = vpow2.f32 %v2409_v30  ;;  %v2383_v62 = vsub.f32 0.0, %v2367_v31 }
 0x3ee   : > { %3162 = vrcp.f32 %v2426_v32  ;;  %v3973_v17 = vadd.f32 %v2834_v33, %v3887_v34  ;;  %v2836_v39 = vpop.f32.mrf.mxu1 }
 0x3ef   : > { %v3149_v18 = vpop.eup %3148  ;;  %v2411_v42 = vmul.f32 1.442695, %v2383_v62  ;;  %v2837_v44 = vadd.f32 %v2836_v39, %v2835_v35 }
 0x3f0   : > { %v3151_v40 = vpop.eup %3150  ;;  %v2487_v41 = vmul.f32 %v3149_v18, %v2471_v36  ;;  %v2368_v48 = vand.u32 2147483647, %v3973_v17  ;;  %v2838_v49 = vpop.f32.mrf.mxu1  ;;  %vm2464_vm14 = vcmp.ge.f32.partialorder %v3973_v17, 0.0 }
 0x3f1   : > { %v2427_v47 = vadd.f32 1.0, %v3151_v40  ;;  %3164 = vpow2.f32 %v2411_v42  ;;  %v3980_v9 = vadd.f32 %v2837_v44, %v3887_v34  ;;  %v2475_v3 = vsel %vm2459_vm9, 1.0, %v3151_v40 }
 0x3f2   : > { %2504 = vst.msk [vmem:[%s3934_s28 + $0x20] sm:$0xff] %vm2499_vm1, %v2487_v41  ;;  %v2384_v38 = vsub.f32 0.0, %v2368_v48  ;;  %v2839_v54 = vpop.f32.mrf.mxu1 }
 0x3f3   : > { %v3153_v52 = vpop.eup %3152  ;;  %3166 = vrcp.f32 %v2427_v47  ;;  %v2369_v57 = vand.u32 2147483647, %v3980_v9  ;;  %v2840_v58 = vadd.f32 %v2839_v54, %v2838_v49  ;;  %vm2465_vm15 = vcmp.ge.f32.partialorder %v3980_v9, 0.0 }
 0x3f4   : > { %v3155_v56 = vpop.eup %3154  ;;  %v2488_v55 = vmul.f32 %v3153_v52, %v2472_v0  ;;  %v2413_v50 = vmul.f32 1.442695, %v2384_v38 }
 0x3f5   : > { %v2428_v59 = vadd.f32 1.0, %v3155_v56  ;;  %v2385_v46 = vsub.f32 0.0, %v2369_v57  ;;  %v3987_v63 = vadd.f32 %v2840_v58, %v3887_v34  ;;  %v2476_v21 = vsel %vm2460_vm10, 1.0, %v3155_v56 }
 0x3f6   : > { %2505 = vst.msk [vmem:[%s3934_s28 + $0x28] sm:$0xff] %vm2499_vm1, %v2488_v55 }
 0x3f7   : > { %3168 = vrcp.f32 %v2428_v59  ;;  %v3157_v1 = vpop.eup %3156  ;;  %v2415_v5 = vmul.f32 1.442695, %v2385_v46  ;;  %v2370_v10 = vand.u32 2147483647, %v3987_v63  ;;  %vm2466_vm0 = vcmp.ge.f32.partialorder %v3987_v63, 0.0 }
 0x3f8   : > { %3170 = vpow2.f32 %v2413_v50  ;;  %v3159_v2 = vpop.eup %3158  ;;  %v2489_v45 = vmul.f32 %v3157_v1, %v2473_v4 }
 0x3f9   : > { %v2429_v43 = vadd.f32 1.0, %v3159_v2  ;;  %3172 = vpow2.f32 %v2415_v5  ;;  %v2386_v11 = vsub.f32 0.0, %v2370_v10  ;;  %v2477_v61 = vsel %vm2461_vm11, 1.0, %v3159_v2 }
 0x3fa   : > { %v3161_v7 = vpop.eup %3160  ;;  %2506 = vst.msk [vmem:[%s3934_s28 + $0x30] sm:$0xff] %vm2499_vm1, %v2489_v45 }
 0x3fb   : > { %v3163_v34 = vpop.eup %3162  ;;  %3174 = vrcp.f32 %v2429_v43  ;;  %v2430_v13 = vadd.f32 1.0, %v3161_v7  ;;  %v2417_v14 = vmul.f32 1.442695, %v2386_v11  ;;  %v2478_v60 = vsel %vm2462_vm12, 1.0, %v3161_v7 }
 0x3fc   : > { %v2490_v15 = vmul.f32 %v3163_v34, %v2474_v22 }
 0x3fd   : > { %3176 = vrcp.f32 %v2430_v13 }
 0x3fe   : > { %v3165_v16 = vpop.eup %3164  ;;  %2507 = vst.msk [vmem:[%s3934_s28 + $0x38] sm:$0xff] %vm2499_vm1, %v2490_v15  ;;  %3178 = vpow2.f32 %v2417_v14 }
 0x3ff   : > { %v2431_v20 = vadd.f32 1.0, %v3165_v16  ;;  %v2479_v33 = vsel %vm2463_vm13, 1.0, %v3165_v16 }
 0x400   : > { %v3167_v19 = vpop.eup %3166 }
 0x401   : > { %v2491_v6 = vmul.f32 %v3167_v19, %v2475_v3  ;;  %3180 = vrcp.f32 %v2431_v20 }
 0x403   : > { %2508 = vst.msk [vmem:[%s3934_s28 + $0x40] sm:$0xff] %vm2499_vm1, %v2491_v6 }
 0x404   : > { %v3169_v29 = vpop.eup %3168 }
 0x405   : > { %v3171_v23 = vpop.eup %3170  ;;  %v2492_v24 = vmul.f32 %v3169_v29, %v2476_v21 }
 0x406   : > { %v2432_v53 = vadd.f32 1.0, %v3171_v23  ;;  %v3173_v26 = vpop.eup %3172  ;;  %v2480_v62 = vsel %vm2464_vm14, 1.0, %v3171_v23 }
 0x407   : > { %2509 = vst.msk [vmem:[%s3934_s28 + $0x48] sm:$0xff] %vm2499_vm1, %v2492_v24  ;;  %v2433_v37 = vadd.f32 1.0, %v3173_v26  ;;  %v2481_v39 = vsel %vm2465_vm15, 1.0, %v3173_v26 }
 0x408   : > { %3182 = vrcp.f32 %v2432_v53  ;;  %v3175_v27 = vpop.eup %3174 }
 0x409   : > { %v2493_v28 = vmul.f32 %v3175_v27, %v2477_v61  ;;  %3184 = vrcp.f32 %v2433_v37 }
 0x40a   : > { %v3177_v51 = vpop.eup %3176 }
 0x40b   : > { %v3179_v30 = vpop.eup %3178  ;;  %2510 = vst.msk [vmem:[%s3934_s28 + $0x50] sm:$0xff] %vm2499_vm1, %v2493_v28  ;;  %v2494_v31 = vmul.f32 %v3177_v51, %v2478_v60 }
 0x40c   : > { %v2434_v32 = vadd.f32 1.0, %v3179_v30  ;;  %v2482_v41 = vsel %vm2466_vm0, 1.0, %v3179_v30 }
 0x40d   : > { %2511 = vst.msk [vmem:[%s3934_s28 + $0x58] sm:$0xff] %vm2499_vm1, %v2494_v31 }
 0x40e   : > { %v3181_v8 = vpop.eup %3180  ;;  %3186 = vrcp.f32 %v2434_v32 }
 0x40f   : > { %v2495_v35 = vmul.f32 %v3181_v8, %v2479_v33 }
 0x411   : > { %2512 = vst.msk [vmem:[%s3934_s28 + $0x60] sm:$0xff] %vm2499_vm1, %v2495_v35 }
 0x415   : > { %v3183_v12 = vpop.eup %3182 }
 0x416   : > { %v2496_v18 = vmul.f32 %v3183_v12, %v2480_v62  ;;  %v3185_v36 = vpop.eup %3184 }
 0x417   : > { %v2497_v40 = vmul.f32 %v3185_v36, %v2481_v39 }
 0x418   : > { %2513 = vst.msk [vmem:[%s3934_s28 + $0x68] sm:$0xff] %vm2499_vm1, %v2496_v18 }
 0x419   : > { %2514 = vst.msk [vmem:[%s3934_s28 + $0x70] sm:$0xff] %vm2499_vm1, %v2497_v40 }
 0x41b   : > { %v3187_v25 = vpop.eup %3186 }
 0x41c   : > { %v2498_v42 = vmul.f32 %v3187_v25, %v2482_v41 }
 0x41e   : > { %2515 = vst.msk [vmem:[%s3934_s28 + $0x78] sm:$0xff] %vm2499_vm1, %v2498_v42 }
 0x41f PF: > { %p21_p3 = scmp.ge.s32.totalorder %s3465_s22, 4   ;;  %s4061_s30 = smov %s3328_s10 }
 0x420   : > { %s4062_s10 = smov %s3332_s11  ;;  %s4063_s11 = smov %s3486_s19 }
 0x421   : > { %s4064_s12 = smov %s3465_s22  ;;  %23 = sbr.rel (!%p21_p3) target bundleno = 5 (0x5), region = 108 }
 0x426   :  { %2538 = vsyncpa [#allocation3], 1 }
 0x427   :  { %2540 = vsyncpa [#allocation3 + $0x1], 1 }
 0x428   :  { %2541 = vsyncpa [#allocation5], 1 }
 0x429   :  { %2542 = vsyncpa [#allocation8], 1 }

</bundles_post_ra>
